<compile_context>
chip_gen: v7x
topology: tpu7x:2x2x1
jax: 0.10.0
libtpu: 0.0.40
codegen_flags: <defaults>
</compile_context>

<pallas_src>
import functools

import jax
import jax.numpy as jnp
from jax.experimental import pallas as pl
from jax.experimental.pallas import tpu as pltpu


def _round_up(x, m):
    return (x + m - 1) // m * m


def _scene_decoder_kernel(hidden_dims, z_ref, vecs_ref, *rest):
    """MLP forward: (Linear -> ReLU -> BatchNorm1d)* -> Linear -> Tanh.

    rest = (*w_hidden_refs, w_out_ref, b_out_ref, out_ref)
    vecs_ref rows: [3*i + 0] = bias_i, [3*i + 1] = gamma_i, [3*i + 2] = beta_i,
    each zero-padded along lanes to max(hidden_dims).
    """
    num_hidden = len(hidden_dims)
    w_refs = rest[:num_hidden]
    w_out_ref = rest[num_hidden]
    b_out_ref = rest[num_hidden + 1]
    out_ref = rest[num_hidden + 2]

    x = z_ref[...].astype(jnp.float32)
    batch = x.shape[0]
    inv_b = jnp.float32(1.0 / batch)
    eps = jnp.float32(1e-5)

    for i, h_dim in enumerate(hidden_dims):
        # MXU matmul in bf16, f32 accumulation.
        h = jnp.dot(x.astype(jnp.bfloat16), w_refs[i][...],
                    preferred_element_type=jnp.float32)

        bias = vecs_ref[3 * i + 0: 3 * i + 1, :h_dim]
        gamma = vecs_ref[3 * i + 1: 3 * i + 2, :h_dim]
        beta = vecs_ref[3 * i + 2: 3 * i + 3, :h_dim]

        # Linear bias + ReLU (module order: Linear -> ReLU -> BatchNorm).
        h = jnp.maximum(h + bias, 0.0)

        # BatchNorm1d, training-mode batch statistics (biased variance),
        # single pass (sum & sum-of-squares), affine folded to one FMA.
        s1 = jnp.sum(h, axis=0, keepdims=True)
        s2 = jnp.sum(h * h, axis=0, keepdims=True)
        mean = s1 * inv_b
        var = jnp.maximum(s2 * inv_b - mean * mean, 0.0)
        scale = gamma * jax.lax.rsqrt(var + eps)   # rsqrt lands on the EUP slot
        shift = beta - mean * scale
        x = h * scale + shift

    y = jnp.dot(x.astype(jnp.bfloat16), w_out_ref[...],
                preferred_element_type=jnp.float32) + b_out_ref[...]
    out_ref[...] = jnp.tanh(y)   # lane-dense (padded to 128) store


def scene_decoder_forward(z, params, abs_dim, max_parts):
    """z: [B, latent_dim] -> [B, max_parts, abs_dim] via one fused Pallas kernel."""
    hidden = params["hidden"]
    hidden_dims = tuple(int(w.shape[1]) for (w, _, _, _) in hidden)
    max_h = max(hidden_dims)
    batch = z.shape[0]
    out_dim = abs_dim * max_parts
    out_pad = _round_up(out_dim, 128)   # lane-dense output; sliced after the call

    # Pack all per-layer small vectors (bias, gamma, beta) into one f32 array:
    # one DMA instead of 3*num_hidden tiny (8,128)-padded VMEM buffers.
    rows = []
    for (_, b, g, be) in hidden:
        for v in (b, g, be):
            v = jnp.reshape(v, (1, -1)).astype(jnp.float32)
            rows.append(jnp.pad(v, ((0, 0), (0, max_h - v.shape[1]))))
    vecs = jnp.concatenate(rows, axis=0)                       # [3*L, max_h]

    # Weights feed the MXU in bf16 (f32 accumulation in-kernel); halves DMA bytes.
    ws = [w.astype(jnp.bfloat16) for (w, _, _, _) in hidden]
    w_out = jnp.pad(params["w_out"],
                    ((0, 0), (0, out_pad - out_dim))).astype(jnp.bfloat16)
    b_out = jnp.pad(jnp.reshape(params["b_out"], (1, -1)).astype(jnp.float32),
                    ((0, 0), (0, out_pad - out_dim)))

    vmem = pl.BlockSpec(memory_space=pltpu.MemorySpace.VMEM)
    flat_inputs = [z.astype(jnp.float32), vecs, *ws, w_out, b_out]

    # TODO(synk): grid-tiled batch (with "parallel" semantics for v7x megacore)
    # would need a two-pass BatchNorm (global stats pass + normalize pass);
    # kept single-block to preserve exact training-mode BN semantics.
    out = pl.pallas_call(
        functools.partial(_scene_decoder_kernel, hidden_dims),
        out_shape=jax.ShapeDtypeStruct((batch, out_pad), jnp.float32),
        in_specs=[vmem] * len(flat_inputs),
        out_specs=vmem,
    )(*flat_inputs)

    return out[:, :out_dim].reshape(batch, max_parts, abs_dim)


def scene_decoder_reference(z, params, abs_dim, max_parts):
    """Pure-JAX reference with the same bf16-matmul / f32-elementwise recipe."""
    x = z.astype(jnp.float32)
    eps = 1e-5
    for (w, b, gamma, beta) in params["hidden"]:
        h = jnp.dot(x.astype(jnp.bfloat16), w.astype(jnp.bfloat16),
                    preferred_element_type=jnp.float32) + jnp.reshape(b, (1, -1))
        h = jnp.maximum(h, 0.0)
        mean = jnp.mean(h, axis=0, keepdims=True)
        var = jnp.mean((h - mean) ** 2, axis=0, keepdims=True)
        x = (h - mean) * jax.lax.rsqrt(var + eps) * jnp.reshape(gamma, (1, -1)) \
            + jnp.reshape(beta, (1, -1))
    y = jnp.dot(x.astype(jnp.bfloat16), params["w_out"].astype(jnp.bfloat16),
                preferred_element_type=jnp.float32) + jnp.reshape(params["b_out"], (1, -1))
    return jnp.tanh(y).reshape(z.shape[0], max_parts, abs_dim)


def init_params(key, latent_dim, hidden_dims, abs_dim, max_parts):
    """Deterministic synthetic params (PyTorch Linear-like init), weights as [in, out]."""
    hidden = []
    in_dim = latent_dim
    for h_dim in hidden_dims:
        key, kw, kb = jax.random.split(key, 3)
        bound = 1.0 / float(in_dim) ** 0.5
        w = jax.random.uniform(kw, (in_dim, h_dim), jnp.float32, -bound, bound)
        b = jax.random.uniform(kb, (h_dim,), jnp.float32, -bound, bound)
        gamma = jnp.ones((h_dim,), jnp.float32)   # BatchNorm1d weight
        beta = jnp.zeros((h_dim,), jnp.float32)   # BatchNorm1d bias
        hidden.append((w, b, gamma, beta))
        in_dim = h_dim
    out_dim = abs_dim * max_parts
    key, kw, kb = jax.random.split(key, 3)
    bound = 1.0 / float(in_dim) ** 0.5
    w_out = jax.random.uniform(kw, (in_dim, out_dim), jnp.float32, -bound, bound)
    b_out = jax.random.uniform(kb, (out_dim,), jnp.float32, -bound, bound)
    return {"hidden": hidden, "w_out": w_out, "b_out": b_out}


if __name__ == "__main__":
    # Small but MXU-friendly shapes: 128 batch rows = one full MXU-height tile;
    # hidden widths are the module defaults (lane-dense multiples of 128).
    batch = 128
    latent_dim = 32
    hidden_dims = [128, 256, 512]
    abs_dim = 8
    max_parts = 4

    key = jax.random.PRNGKey(0)
    key, kz = jax.random.split(key)
    z = jax.random.normal(kz, (batch, latent_dim), jnp.float32)
    params = init_params(key, latent_dim, hidden_dims, abs_dim, max_parts)

    x = scene_decoder_forward(z, params, abs_dim, max_parts)
    x = jax.block_until_ready(x)

    x_ref = scene_decoder_reference(z, params, abs_dim, max_parts)

    assert x.shape == (batch, max_parts, abs_dim)
    assert bool(jnp.all(jnp.isfinite(x)))
    assert bool(jnp.all(jnp.abs(x) <= 1.0 + 1e-6))   # tanh range
    err = float(jnp.max(jnp.abs(x - x_ref)))
    assert err < 2e-2, f"kernel/reference mismatch: max abs err = {err}"
    print("KERNEL_OK")
</pallas_src>

<mosaic_0001>
module attributes {stable_mosaic.version = 11 : i64} {
  func.func @_scene_decoder_kernel(%arg0: memref<128x32xf32, #tpu.memory_space<vmem>>, %arg1: memref<9x512xf32, #tpu.memory_space<vmem>>, %arg2: memref<32x128xbf16, #tpu.memory_space<vmem>>, %arg3: memref<128x256xbf16, #tpu.memory_space<vmem>>, %arg4: memref<256x512xbf16, #tpu.memory_space<vmem>>, %arg5: memref<512x128xbf16, #tpu.memory_space<vmem>>, %arg6: memref<1x128xf32, #tpu.memory_space<vmem>>, %arg7: memref<128x128xf32, #tpu.memory_space<vmem>>) attributes {dimension_semantics = [], scalar_prefetch = 0 : i64, scratch_operands = 0 : i64, tpu.core_type = #tpu.core_type<tc>} {
    %c0 = arith.constant 0 : index
    %c0_0 = arith.constant 0 : index
    %0 = vector.load %arg0[%c0, %c0_0] : memref<128x32xf32, #tpu.memory_space<vmem>>, vector<128x32xf32>
    %1 = arith.truncf %0 : vector<128x32xf32> to vector<128x32xbf16>
    %c0_1 = arith.constant 0 : index
    %c0_2 = arith.constant 0 : index
    %2 = vector.load %arg2[%c0_1, %c0_2] : memref<32x128xbf16, #tpu.memory_space<vmem>>, vector<32x128xbf16>
    %cst = arith.constant dense<0.000000e+00> : vector<128x128xf32>
    %3 = tpu.matmul %1, %2, %cst {dimension_numbers = #tpu.dot_dimension_numbers<[1], [0], [0], [1], [0, 0, 1, 1], [], []>} : vector<128x32xbf16>, vector<32x128xbf16>, vector<128x128xf32> -> vector<128x128xf32>
    %c0_3 = arith.constant 0 : index
    %c0_4 = arith.constant 0 : index
    %4 = vector.load %arg1[%c0_3, %c0_4] : memref<9x512xf32, #tpu.memory_space<vmem>>, vector<1x128xf32>
    %c1 = arith.constant 1 : index
    %c0_5 = arith.constant 0 : index
    %5 = vector.load %arg1[%c1, %c0_5] : memref<9x512xf32, #tpu.memory_space<vmem>>, vector<1x128xf32>
    %c2 = arith.constant 2 : index
    %c0_6 = arith.constant 0 : index
    %6 = vector.load %arg1[%c2, %c0_6] : memref<9x512xf32, #tpu.memory_space<vmem>>, vector<1x128xf32>
    %7 = vector.broadcast %4 : vector<1x128xf32> to vector<128x128xf32>
    %8 = arith.addf %3, %7 : vector<128x128xf32>
    %cst_7 = arith.constant 0.000000e+00 : f32
    %9 = vector.broadcast %cst_7 : f32 to vector<128x128xf32>
    %10 = arith.maximumf %8, %9 : vector<128x128xf32>
    %cst_8 = arith.constant dense<0.000000e+00> : vector<128xf32>
    %11 = vector.multi_reduction <add>, %10, %cst_8 [0] : vector<128x128xf32> to vector<128xf32>
    %12 = vector.shape_cast %11 : vector<128xf32> to vector<1x128xf32>
    %13 = arith.mulf %10, %10 : vector<128x128xf32>
    %cst_9 = arith.constant dense<0.000000e+00> : vector<128xf32>
    %14 = vector.multi_reduction <add>, %13, %cst_9 [0] : vector<128x128xf32> to vector<128xf32>
    %15 = vector.shape_cast %14 : vector<128xf32> to vector<1x128xf32>
    %cst_10 = arith.constant 7.812500e-03 : f32
    %16 = vector.broadcast %cst_10 : f32 to vector<1x128xf32>
    %17 = arith.mulf %12, %16 : vector<1x128xf32>
    %cst_11 = arith.constant 7.812500e-03 : f32
    %18 = vector.broadcast %cst_11 : f32 to vector<1x128xf32>
    %19 = arith.mulf %15, %18 : vector<1x128xf32>
    %20 = arith.mulf %17, %17 : vector<1x128xf32>
    %21 = arith.subf %19, %20 : vector<1x128xf32>
    %cst_12 = arith.constant 0.000000e+00 : f32
    %22 = vector.broadcast %cst_12 : f32 to vector<1x128xf32>
    %23 = arith.maximumf %21, %22 : vector<1x128xf32>
    %cst_13 = arith.constant 9.99999974E-6 : f32
    %24 = vector.broadcast %cst_13 : f32 to vector<1x128xf32>
    %25 = arith.addf %23, %24 : vector<1x128xf32>
    %26 = math.rsqrt %25 : vector<1x128xf32>
    %27 = arith.mulf %5, %26 : vector<1x128xf32>
    %28 = arith.mulf %17, %27 : vector<1x128xf32>
    %29 = arith.subf %6, %28 : vector<1x128xf32>
    %30 = vector.broadcast %27 : vector<1x128xf32> to vector<128x128xf32>
    %31 = arith.mulf %10, %30 : vector<128x128xf32>
    %32 = vector.broadcast %29 : vector<1x128xf32> to vector<128x128xf32>
    %33 = arith.addf %31, %32 : vector<128x128xf32>
    %34 = arith.truncf %33 : vector<128x128xf32> to vector<128x128xbf16>
    %c0_14 = arith.constant 0 : index
    %c0_15 = arith.constant 0 : index
    %35 = vector.load %arg3[%c0_14, %c0_15] : memref<128x256xbf16, #tpu.memory_space<vmem>>, vector<128x256xbf16>
    %cst_16 = arith.constant dense<0.000000e+00> : vector<128x256xf32>
    %36 = tpu.matmul %34, %35, %cst_16 {dimension_numbers = #tpu.dot_dimension_numbers<[1], [0], [0], [1], [0, 0, 1, 1], [], []>} : vector<128x128xbf16>, vector<128x256xbf16>, vector<128x256xf32> -> vector<128x256xf32>
    %c3 = arith.constant 3 : index
    %c0_17 = arith.constant 0 : index
    %37 = vector.load %arg1[%c3, %c0_17] : memref<9x512xf32, #tpu.memory_space<vmem>>, vector<1x256xf32>
    %c4 = arith.constant 4 : index
    %c0_18 = arith.constant 0 : index
    %38 = vector.load %arg1[%c4, %c0_18] : memref<9x512xf32, #tpu.memory_space<vmem>>, vector<1x256xf32>
    %c5 = arith.constant 5 : index
    %c0_19 = arith.constant 0 : index
    %39 = vector.load %arg1[%c5, %c0_19] : memref<9x512xf32, #tpu.memory_space<vmem>>, vector<1x256xf32>
    %40 = vector.broadcast %37 : vector<1x256xf32> to vector<128x256xf32>
    %41 = arith.addf %36, %40 : vector<128x256xf32>
    %cst_20 = arith.constant 0.000000e+00 : f32
    %42 = vector.broadcast %cst_20 : f32 to vector<128x256xf32>
    %43 = arith.maximumf %41, %42 : vector<128x256xf32>
    %cst_21 = arith.constant dense<0.000000e+00> : vector<256xf32>
    %44 = vector.multi_reduction <add>, %43, %cst_21 [0] : vector<128x256xf32> to vector<256xf32>
    %45 = vector.shape_cast %44 : vector<256xf32> to vector<1x256xf32>
    %46 = arith.mulf %43, %43 : vector<128x256xf32>
    %cst_22 = arith.constant dense<0.000000e+00> : vector<256xf32>
    %47 = vector.multi_reduction <add>, %46, %cst_22 [0] : vector<128x256xf32> to vector<256xf32>
    %48 = vector.shape_cast %47 : vector<256xf32> to vector<1x256xf32>
    %cst_23 = arith.constant 7.812500e-03 : f32
    %49 = vector.broadcast %cst_23 : f32 to vector<1x256xf32>
    %50 = arith.mulf %45, %49 : vector<1x256xf32>
    %cst_24 = arith.constant 7.812500e-03 : f32
    %51 = vector.broadcast %cst_24 : f32 to vector<1x256xf32>
    %52 = arith.mulf %48, %51 : vector<1x256xf32>
    %53 = arith.mulf %50, %50 : vector<1x256xf32>
    %54 = arith.subf %52, %53 : vector<1x256xf32>
    %cst_25 = arith.constant 0.000000e+00 : f32
    %55 = vector.broadcast %cst_25 : f32 to vector<1x256xf32>
    %56 = arith.maximumf %54, %55 : vector<1x256xf32>
    %cst_26 = arith.constant 9.99999974E-6 : f32
    %57 = vector.broadcast %cst_26 : f32 to vector<1x256xf32>
    %58 = arith.addf %56, %57 : vector<1x256xf32>
    %59 = math.rsqrt %58 : vector<1x256xf32>
    %60 = arith.mulf %38, %59 : vector<1x256xf32>
    %61 = arith.mulf %50, %60 : vector<1x256xf32>
    %62 = arith.subf %39, %61 : vector<1x256xf32>
    %63 = vector.broadcast %60 : vector<1x256xf32> to vector<128x256xf32>
    %64 = arith.mulf %43, %63 : vector<128x256xf32>
    %65 = vector.broadcast %62 : vector<1x256xf32> to vector<128x256xf32>
    %66 = arith.addf %64, %65 : vector<128x256xf32>
    %67 = arith.truncf %66 : vector<128x256xf32> to vector<128x256xbf16>
    %c0_27 = arith.constant 0 : index
    %c0_28 = arith.constant 0 : index
    %68 = vector.load %arg4[%c0_27, %c0_28] : memref<256x512xbf16, #tpu.memory_space<vmem>>, vector<256x512xbf16>
    %cst_29 = arith.constant dense<0.000000e+00> : vector<128x512xf32>
    %69 = tpu.matmul %67, %68, %cst_29 {dimension_numbers = #tpu.dot_dimension_numbers<[1], [0], [0], [1], [0, 0, 1, 1], [], []>} : vector<128x256xbf16>, vector<256x512xbf16>, vector<128x512xf32> -> vector<128x512xf32>
    %c6 = arith.constant 6 : index
    %c0_30 = arith.constant 0 : index
    %70 = vector.load %arg1[%c6, %c0_30] : memref<9x512xf32, #tpu.memory_space<vmem>>, vector<1x512xf32>
    %c7 = arith.constant 7 : index
    %c0_31 = arith.constant 0 : index
    %71 = vector.load %arg1[%c7, %c0_31] : memref<9x512xf32, #tpu.memory_space<vmem>>, vector<1x512xf32>
    %c8 = arith.constant 8 : index
    %c0_32 = arith.constant 0 : index
    %72 = vector.load %arg1[%c8, %c0_32] : memref<9x512xf32, #tpu.memory_space<vmem>>, vector<1x512xf32>
    %73 = vector.broadcast %70 : vector<1x512xf32> to vector<128x512xf32>
    %74 = arith.addf %69, %73 : vector<128x512xf32>
    %cst_33 = arith.constant 0.000000e+00 : f32
    %75 = vector.broadcast %cst_33 : f32 to vector<128x512xf32>
    %76 = arith.maximumf %74, %75 : vector<128x512xf32>
    %cst_34 = arith.constant dense<0.000000e+00> : vector<512xf32>
    %77 = vector.multi_reduction <add>, %76, %cst_34 [0] : vector<128x512xf32> to vector<512xf32>
    %78 = vector.shape_cast %77 : vector<512xf32> to vector<1x512xf32>
    %79 = arith.mulf %76, %76 : vector<128x512xf32>
    %cst_35 = arith.constant dense<0.000000e+00> : vector<512xf32>
    %80 = vector.multi_reduction <add>, %79, %cst_35 [0] : vector<128x512xf32> to vector<512xf32>
    %81 = vector.shape_cast %80 : vector<512xf32> to vector<1x512xf32>
    %cst_36 = arith.constant 7.812500e-03 : f32
    %82 = vector.broadcast %cst_36 : f32 to vector<1x512xf32>
    %83 = arith.mulf %78, %82 : vector<1x512xf32>
    %cst_37 = arith.constant 7.812500e-03 : f32
    %84 = vector.broadcast %cst_37 : f32 to vector<1x512xf32>
    %85 = arith.mulf %81, %84 : vector<1x512xf32>
    %86 = arith.mulf %83, %83 : vector<1x512xf32>
    %87 = arith.subf %85, %86 : vector<1x512xf32>
    %cst_38 = arith.constant 0.000000e+00 : f32
    %88 = vector.broadcast %cst_38 : f32 to vector<1x512xf32>
    %89 = arith.maximumf %87, %88 : vector<1x512xf32>
    %cst_39 = arith.constant 9.99999974E-6 : f32
    %90 = vector.broadcast %cst_39 : f32 to vector<1x512xf32>
    %91 = arith.addf %89, %90 : vector<1x512xf32>
    %92 = math.rsqrt %91 : vector<1x512xf32>
    %93 = arith.mulf %71, %92 : vector<1x512xf32>
    %94 = arith.mulf %83, %93 : vector<1x512xf32>
    %95 = arith.subf %72, %94 : vector<1x512xf32>
    %96 = vector.broadcast %93 : vector<1x512xf32> to vector<128x512xf32>
    %97 = arith.mulf %76, %96 : vector<128x512xf32>
    %98 = vector.broadcast %95 : vector<1x512xf32> to vector<128x512xf32>
    %99 = arith.addf %97, %98 : vector<128x512xf32>
    %100 = arith.truncf %99 : vector<128x512xf32> to vector<128x512xbf16>
    %c0_40 = arith.constant 0 : index
    %c0_41 = arith.constant 0 : index
    %101 = vector.load %arg5[%c0_40, %c0_41] : memref<512x128xbf16, #tpu.memory_space<vmem>>, vector<512x128xbf16>
    %cst_42 = arith.constant dense<0.000000e+00> : vector<128x128xf32>
    %102 = tpu.matmul %100, %101, %cst_42 {dimension_numbers = #tpu.dot_dimension_numbers<[1], [0], [0], [1], [0, 0, 1, 1], [], []>} : vector<128x512xbf16>, vector<512x128xbf16>, vector<128x128xf32> -> vector<128x128xf32>
    %c0_43 = arith.constant 0 : index
    %c0_44 = arith.constant 0 : index
    %103 = vector.load %arg6[%c0_43, %c0_44] : memref<1x128xf32, #tpu.memory_space<vmem>>, vector<1x128xf32>
    %104 = vector.broadcast %103 : vector<1x128xf32> to vector<128x128xf32>
    %105 = arith.addf %102, %104 : vector<128x128xf32>
    %106 = math.tanh %105 : vector<128x128xf32>
    %c0_45 = arith.constant 0 : index
    %c0_46 = arith.constant 0 : index
    %107 = vector.load %arg7[%c0_45, %c0_46] : memref<128x128xf32, #tpu.memory_space<vmem>>, vector<128x128xf32>
    tpu.vector_store %arg7[%c0_45, %c0_46], %106 {strides = array<i32>} : memref<128x128xf32, #tpu.memory_space<vmem>>, vector<128x128xf32>,
    return
  }
}

</mosaic_0001>

<bundles_post_ra>
// kernel: tpu_custom_call.1
= control target key start
LH: loop header
LB: loop body
LE: loop exit
PB: predicated region body
PF: predicated region fallthrough
CT: control target
= control target key end

     0   :  { %12 = vsyncpa [#allocation3], 0  ;;  %s4493_s0 = inlined_call_operand.vmem [shape: f32[128,32], index: 0, kind: input, shape index: {}]   ;;  %s4494_s1 = inlined_call_operand.hbm [shape: f32[9,512], index: 1, kind: input, shape index: {}]   ;;  %s4495_s2 = inlined_call_operand.vmem [shape: bf16[32,128], index: 2, kind: input, shape index: {}]   ;;  %s4496_s3 = inlined_call_operand.vmem [shape: bf16[128,256], index: 3, kind: input, shape index: {}]   ;;  %s4497_s4 = inlined_call_operand.hbm [shape: bf16[256,512], index: 4, kind: input, shape index: {}]   ;;  %s4498_s5 = inlined_call_operand.hbm [shape: bf16[512,128], index: 5, kind: input, shape index: {}]   ;;  %s4499_s6 = inlined_call_operand.vmem [shape: f32[1,128], index: 6, kind: input, shape index: {}]   ;;  %s4500_s7 = inlined_call_operand.hbm [shape: f32[128,128], index: 7, kind: output, shape index: {}]  }
   0x1   :  { %13 = vsyncpa [#allocation6], 0 }
   0x2   :  { %14 = vsyncpa [#allocation4], 0  ;;  %s3242_s24 = smov [#allocation5]   ;;  %s3148_s28 = scalar_lea.hbm %s4497_s4, 8192 }
   0x3   :  { %s38_s25 = sshll.u32 %s3242_s24, 4  ;;  %p3149_p0 = scmp.ne.s32.totalorder %s4497_s4, %s3148_s28  ;;  %s39_s25 = int_to_ptr.vmem [resolvable:$true] %s38_s25 }
   0x4   :  { %p3152_p1 = scmp.lt.u32.totalorder %s3148_s28, %s4497_s4 }
   0x6   :  { %p3154_p2 = pnand %p3152_p1, %p3149_p0 }
   0x8   :  { %3157 = shalt.err (!%p3154_p2)
}
   0x9   :  { %s3158_s10 = scalar_lea.vmem %s39_s25, 8192  ;;  %p3163_p4 = scmp.lt.s32.totalorder %s39_s25, %s39_s25 }
   0xa   :  { %p3159_p3 = scmp.ne.s32.totalorder %s39_s25, %s3158_s10  ;;  %p3164_p5 = scmp.lt.s32.totalorder %s3158_s10, %s3158_s10 }
   0xc   :  { %p3165_p6 = por %p3164_p5, %p3163_p4 }
   0xe   :  { %p3166_p7 = pnand %p3165_p6, %p3159_p3 }
  0x10   :  { %3169 = shalt.err (!%p3166_p7)
}
  0x11   :  { %s3243_s11 = smov 256   ;;  %s3244_s12 = smov 16  }
  0x12   :  { %44 = dma.hbm_to_vmem [thread:$0]  %s4497_s4, 8192, %s39_s25, [#allocation6], %s3243_s11, %s3243_s11, %s3244_s12  }
  0x13   :  { %s3245_s15 = smov [#allocation2]   ;;  %s3170_s19 = scalar_lea.hbm %s4494_s1, 1024 }
  0x14   :  { %s22_s16 = sshll.u32 %s3245_s15, 4  ;;  %p3171_p8 = scmp.ne.s32.totalorder %s4494_s1, %s3170_s19  ;;  %s23_s16 = int_to_ptr.vmem [resolvable:$true] %s22_s16 }
  0x15   :  { %p3174_p9 = scmp.lt.u32.totalorder %s3170_s19, %s4494_s1 }
  0x17   :  { %p3176_p10 = pnand %p3174_p9, %p3171_p8 }
  0x19   :  { %3179 = shalt.err (!%p3176_p10)
}
  0x1a   :  { %s3180_s24 = scalar_lea.vmem %s23_s16, 1024  ;;  %p3185_p12 = scmp.lt.s32.totalorder %s23_s16, %s23_s16 }
  0x1b   :  { %p3181_p11 = scmp.ne.s32.totalorder %s23_s16, %s3180_s24  ;;  %p3186_p13 = scmp.lt.s32.totalorder %s3180_s24, %s3180_s24 }
  0x1d   :  { %p3187_p0 = por %p3186_p13, %p3185_p12 }
  0x1f   :  { %p3188_p1 = pnand %p3187_p0, %p3181_p11 }
  0x21   :  { %3191 = shalt.err (!%p3188_p1)
}
  0x22   :  { %s3246_s4 = smov 512   ;;  %s3247_s25 = smov 32  }
  0x23   :  { %28 = dma.hbm_to_vmem [thread:$0]  %s4494_s1, 1024, %s23_s16, [#allocation3], %s3246_s4, %s3246_s4, %s3247_s25  }
  0x24   :  { %s3248_s28 = smov [#allocation7]   ;;  %s3192_s9 = scalar_lea.hbm %s4498_s5, 4096 }
  0x25   :  { %s50_s29 = sshll.u32 %s3248_s28, 4  ;;  %p3193_p2 = scmp.ne.s32.totalorder %s4498_s5, %s3192_s9  ;;  %s51_s29 = int_to_ptr.vmem [resolvable:$true] %s50_s29 }
  0x26   :  { %p3196_p3 = scmp.lt.u32.totalorder %s3192_s9, %s4498_s5 }
  0x28   :  { %p3198_p4 = pnand %p3196_p3, %p3193_p2 }
  0x2a   :  { %3201 = shalt.err (!%p3198_p4)
}
  0x2b   :  { %s3202_s14 = scalar_lea.vmem %s51_s29, 4096  ;;  %p3207_p6 = scmp.lt.s32.totalorder %s51_s29, %s51_s29 }
  0x2c   :  { %p3203_p5 = scmp.ne.s32.totalorder %s51_s29, %s3202_s14  ;;  %p3208_p7 = scmp.lt.s32.totalorder %s3202_s14, %s3202_s14 }
  0x2e   :  { %p3209_p8 = por %p3208_p7, %p3207_p6 }
  0x30   :  { %p3210_p9 = pnand %p3209_p8, %p3203_p5 }
  0x32   :  { %3213 = shalt.err (!%p3210_p9)
}
  0x33   :  { %s3249_s1 = smov 64   ;;  %s3250_s15 = smov 4  }
  0x34   :  { %56 = dma.hbm_to_vmem [thread:$0]  %s4498_s5, 4096, %s51_s29, [#allocation6], %s3249_s1, %s3249_s1, %s3250_s15  }
  0x35   :  { %3236 = dma.done.wait [#allocation3], 1024  }
  0x36   :  { %3237 = vsyncadd [#allocation3], 4294966272 }
  0x37   :  { %3238 = dma.done.wait [#allocation6], 12288  }
  0x38   :  { %3239 = vsyncadd [#allocation6], 4294955008  ;;  %v2933_v0 = vld [vmem:[%s4495_s2] sm:$0xff]   ;;  %v2934_v1 = vld [vmem:[%s4495_s2 + $0x8] sm:$0xff]   ;;  %vm112_vm0 = vcmask 261120   ;;  %v3251_v42 = vmov 0  }
  0x39   :  { %2883 = vmatprep.subr.bf16.mxu0 %v2933_v0  ;;  %v69_v2 = vld [vmem:[%s4493_s0] sm:$0xff]  ;;  %v70_v3 = vld [vmem:[%s4493_s0 + $0x8] sm:$0xff]  ;;  %v71_v5 = vld [vmem:[%s4493_s0 + $0x10] sm:$0xff]  ;;  %503 = vmatprep.mubr.bf16.mxu1 %v3251_v42 }
  0x3a   :  { %2884 = vmatpush3.bf16.msra.mxu0 %v2933_v0  ;;  %v85_v4 = vpack.c.bf16 %v70_v3, %v69_v2  ;;  %v72_v6 = vld [vmem:[%s4493_s0 + $0x18] sm:$0xff]  ;;  %v73_v7 = vld [vmem:[%s4493_s0 + $0x20] sm:$0xff]  ;;  %v74_v8 = vld [vmem:[%s4493_s0 + $0x28] sm:$0xff] }
  0x3b   :  { %2885 = vmatprep.subr.bf16.mxu0 %v2934_v1  ;;  %v86_v9 = vpack.c.bf16 %v72_v6, %v71_v5  ;;  %v87_v10 = vpack.c.bf16 %v74_v8, %v73_v7  ;;  %v75_v11 = vld [vmem:[%s4493_s0 + $0x30] sm:$0xff]  ;;  %v76_v12 = vld [vmem:[%s4493_s0 + $0x38] sm:$0xff]  ;;  %v77_v13 = vld [vmem:[%s4493_s0 + $0x40] sm:$0xff] }
  0x3c   :  { %2887 = vmatprep.mubr.msk.bf16.mxu0 %vm112_vm0, %v85_v4  ;;  %v78_v14 = vld [vmem:[%s4493_s0 + $0x48] sm:$0xff]  ;;  %v88_v15 = vpack.c.bf16 %v76_v12, %v75_v11  ;;  %v79_v17 = vld [vmem:[%s4493_s0 + $0x50] sm:$0xff]  ;;  %v80_v18 = vld [vmem:[%s4493_s0 + $0x58] sm:$0xff] }
  0x3d   :  { %v89_v16 = vpack.c.bf16 %v78_v14, %v77_v13  ;;  %v81_v19 = vld [vmem:[%s4493_s0 + $0x60] sm:$0xff]  ;;  %v82_v20 = vld [vmem:[%s4493_s0 + $0x68] sm:$0xff]  ;;  %v90_v21 = vpack.c.bf16 %v80_v18, %v79_v17  ;;  %v83_v23 = vld [vmem:[%s4493_s0 + $0x70] sm:$0xff] }
  0x3e   :  { %2886 = vmatpush3.bf16.msra.mxu0 %v2934_v1  ;;  %v91_v22 = vpack.c.bf16 %v82_v20, %v81_v19  ;;  %v84_v24 = vld [vmem:[%s4493_s0 + $0x78] sm:$0xff]  ;;  %v2935_v26 = vld [vmem:[%s4496_s3 + $0x4] ss:$8 sps:$4 sm:$0xff]   ;;  %v2937_v27 = vld [vmem:[%s4496_s3] ss:$8 sps:$4 sm:$0xff]  }
  0x3f   :  { %v92_v25 = vpack.c.bf16 %v84_v24, %v83_v23  ;;  %471 = vmatprep.subr.bf16.mxu1 %v2935_v26  ;;  %v2938_v28 = vld [vmem:[%s4496_s3 + $0x14] ss:$8 sps:$4 sm:$0xff]   ;;  %v2940_v29 = vld [vmem:[%s4496_s3 + $0x10] ss:$8 sps:$4 sm:$0xff]   ;;  %v2941_v30 = vld [vmem:[%s4496_s3 + $0x24] ss:$8 sps:$4 sm:$0xff]  }
  0x40   :  { %472 = vmatpush1.bf16.msra.mxu1 %v2937_v27  ;;  %v2943_v31 = vld [vmem:[%s4496_s3 + $0x20] ss:$8 sps:$4 sm:$0xff]   ;;  %v2944_v32 = vld [vmem:[%s4496_s3 + $0x34] ss:$8 sps:$4 sm:$0xff]   ;;  %v2946_v33 = vld [vmem:[%s4496_s3 + $0x30] ss:$8 sps:$4 sm:$0xff]  }
  0x41   :  { %2888 = vmatmul.mubr.msk.bf16.vlgmr.msra.gmra.mrb[0].mxu0 %vm112_vm0, %v86_v9  ;;  %473 = vmatprep.subr.bf16.mxu1 %v2938_v28  ;;  %v2947_v34 = vld [vmem:[%s4496_s3 + $0x44] ss:$8 sps:$4 sm:$0xff]   ;;  %v2949_v35 = vld [vmem:[%s4496_s3 + $0x40] ss:$8 sps:$4 sm:$0xff]   ;;  %v2950_v36 = vld [vmem:[%s4496_s3 + $0x54] ss:$8 sps:$4 sm:$0xff]  }
  0x42   :  { %2891 = vmatprep.mubr.msk.bf16.mxu0 %vm112_vm0, %v87_v10  ;;  %v2952_v37 = vld [vmem:[%s4496_s3 + $0x50] ss:$8 sps:$4 sm:$0xff]   ;;  %v2953_v38 = vld [vmem:[%s4496_s3 + $0x64] ss:$8 sps:$4 sm:$0xff]   ;;  %v2955_v39 = vld [vmem:[%s4496_s3 + $0x60] ss:$8 sps:$4 sm:$0xff]  }
  0x43   :  { %v2956_v40 = vld [vmem:[%s4496_s3 + $0x74] ss:$8 sps:$4 sm:$0xff]   ;;  %v2958_v41 = vld [vmem:[%s4496_s3 + $0x70] ss:$8 sps:$4 sm:$0xff]   ;;  %v3443_v43 = vld [vmem:[#allocation2] ss:$0 sm:$0xff] }
  0x44   :  { %474 = vmatpush1.bf16.msra.mxu1 %v2940_v29 }
  0x45   :  { %475 = vmatprep.subr.bf16.mxu1 %v2941_v30 }
  0x48   :  { %476 = vmatpush1.bf16.msra.mxu1 %v2943_v31 }
  0x49   :  { %2892 = vmatmul.mubr.msk.bf16.gmra.mrb[4].mxu0 %vm112_vm0, %v88_v15  ;;  %477 = vmatprep.subr.bf16.mxu1 %v2944_v32 }
  0x4a   :  { %2895 = vmatprep.mubr.msk.bf16.mxu0 %vm112_vm0, %v89_v16 }
  0x4c   :  { %478 = vmatpush1.bf16.msra.mxu1 %v2946_v33 }
  0x4d   :  { %479 = vmatprep.subr.bf16.mxu1 %v2947_v34 }
  0x50   :  { %480 = vmatpush1.bf16.msra.mxu1 %v2949_v35 }
  0x51   :  { %2896 = vmatmul.mubr.msk.bf16.gmra.mrb[8].mxu0 %vm112_vm0, %v90_v21  ;;  %481 = vmatprep.subr.bf16.mxu1 %v2950_v36 }
  0x52   :  { %2899 = vmatprep.mubr.msk.bf16.mxu0 %vm112_vm0, %v91_v22 }
  0x54   :  { %482 = vmatpush1.bf16.msra.mxu1 %v2952_v37 }
  0x55   :  { %483 = vmatprep.subr.bf16.mxu1 %v2953_v38 }
  0x58   :  { %484 = vmatpush1.bf16.msra.mxu1 %v2955_v39 }
  0x59   :  { %2900 = vmatmul.mubr.msk.bf16.gmra.mrb[12].mxu0 %vm112_vm0, %v92_v25  ;;  %485 = vmatprep.subr.bf16.mxu1 %v2956_v40 }
  0x5c   :  { %486 = vmatpush1.bf16.msra.mxu1 %v2958_v41 }
 0x114   :  { %v2889_v44 = vpop.f32.mrb[0].mxu0 }
 0x115   :  { %v171_v45 = vpop.f32.mrb[1].mxu0  ;;  %v180_v46 = vadd.f32 %v2889_v44, %v3443_v43 }
 0x116   :  { %v172_v47 = vadd.f32 %v171_v45, %v3443_v43  ;;  %v2890_v48 = vpop.f32.mrb[2].mxu0 }
 0x117   :  { %v183_v49 = vadd.f32 %v2890_v48, %v3443_v43  ;;  %v174_v50 = vpop.f32.mrb[3].mxu0  ;;  %v3451_v53 = vmax.f32 %v180_v46, 0.0 }
 0x118   :  { %v3448_v51 = vmax.f32 %v172_v47, 0.0  ;;  %v175_v52 = vadd.f32 %v174_v50, %v3443_v43 }
 0x119   :  { %v3455_v55 = vmax.f32 %v183_v49, 0.0  ;;  %v273_v62 = vmul.f32 %v3451_v53, %v3451_v53 }
 0x11a   :  { %v3453_v54 = vmax.f32 %v175_v52, 0.0  ;;  %v271_v56 = vmul.f32 %v3448_v51, %v3448_v51 }
 0x11b   :  { %v274_v3 = vmul.f32 %v3455_v55, %v3455_v55 }
 0x11c   :  { %v250_v57 = vadd.f32 %v3453_v54, %v3448_v51  ;;  %v272_v58 = vmul.f32 %v3453_v54, %v3453_v54  ;;  %v2893_v59 = vpop.f32.mrb[4].mxu0 }
 0x11d   :  { %v196_v60 = vadd.f32 %v2893_v59, %v3443_v43  ;;  %v187_v61 = vpop.f32.mrb[5].mxu0 }
 0x11e   :  { %v251_v63 = vadd.f32 %v250_v57, %v3451_v53  ;;  %v287_v0 = vadd.f32 %v272_v58, %v271_v56  ;;  %v188_v1 = vadd.f32 %v187_v61, %v3443_v43  ;;  %v2894_v2 = vpop.f32.mrb[6].mxu0 }
 0x11f   :  { %v199_v4 = vadd.f32 %v2894_v2, %v3443_v43  ;;  %v190_v5 = vpop.f32.mrb[7].mxu0  ;;  %v3475_v10 = vmax.f32 %v196_v60, 0.0 }
 0x120   :  { %v288_v6 = vadd.f32 %v287_v0, %v273_v62  ;;  %v3471_v7 = vmax.f32 %v188_v1, 0.0  ;;  %v252_v8 = vadd.f32 %v251_v63, %v3455_v55  ;;  %v191_v9 = vadd.f32 %v190_v5, %v3443_v43 }
 0x121   :  { %v3482_v15 = vmax.f32 %v199_v4, 0.0  ;;  %v277_v22 = vmul.f32 %v3475_v10, %v3475_v10 }
 0x122   :  { %v253_v11 = vadd.f32 %v252_v8, %v3471_v7  ;;  %v275_v12 = vmul.f32 %v3471_v7, %v3471_v7  ;;  %v289_v13 = vadd.f32 %v288_v6, %v274_v3  ;;  %v3480_v14 = vmax.f32 %v191_v9, 0.0 }
 0x123   :  { %v278_v27 = vmul.f32 %v3482_v15, %v3482_v15 }
 0x124   :  { %v290_v16 = vadd.f32 %v289_v13, %v275_v12  ;;  %v254_v17 = vadd.f32 %v253_v11, %v3480_v14  ;;  %v276_v18 = vmul.f32 %v3480_v14, %v3480_v14  ;;  %v2897_v19 = vpop.f32.mrb[8].mxu0 }
 0x125   :  { %v212_v20 = vadd.f32 %v2897_v19, %v3443_v43  ;;  %v203_v21 = vpop.f32.mrb[9].mxu0 }
 0x126   :  { %v255_v23 = vadd.f32 %v254_v17, %v3475_v10  ;;  %v291_v24 = vadd.f32 %v290_v16, %v276_v18  ;;  %v204_v25 = vadd.f32 %v203_v21, %v3443_v43  ;;  %v2898_v26 = vpop.f32.mrb[10].mxu0 }
 0x127   :  { %v215_v28 = vadd.f32 %v2898_v26, %v3443_v43  ;;  %v206_v29 = vpop.f32.mrb[11].mxu0  ;;  %v3499_v34 = vmax.f32 %v212_v20, 0.0 }
 0x128   :  { %v292_v30 = vadd.f32 %v291_v24, %v277_v22  ;;  %v3495_v31 = vmax.f32 %v204_v25, 0.0  ;;  %v256_v32 = vadd.f32 %v255_v23, %v3482_v15  ;;  %v207_v33 = vadd.f32 %v206_v29, %v3443_v43 }
 0x129   :  { %v3506_v39 = vmax.f32 %v215_v28, 0.0  ;;  %v281_v48 = vmul.f32 %v3499_v34, %v3499_v34 }
 0x12a   :  { %v257_v35 = vadd.f32 %v256_v32, %v3495_v31  ;;  %v279_v36 = vmul.f32 %v3495_v31, %v3495_v31  ;;  %v293_v37 = vadd.f32 %v292_v30, %v278_v27  ;;  %v3504_v38 = vmax.f32 %v207_v33, 0.0 }
 0x12b   :  { %v282_v57 = vmul.f32 %v3506_v39, %v3506_v39 }
 0x12c   :  { %v294_v40 = vadd.f32 %v293_v37, %v279_v36  ;;  %v258_v41 = vadd.f32 %v257_v35, %v3504_v38  ;;  %v280_v44 = vmul.f32 %v3504_v38, %v3504_v38  ;;  %v2901_v45 = vpop.f32.mrb[12].mxu0 }
 0x12d   :  { %v228_v46 = vadd.f32 %v2901_v45, %v3443_v43  ;;  %v219_v47 = vpop.f32.mrb[13].mxu0 }
 0x12e   :  { %v259_v49 = vadd.f32 %v258_v41, %v3499_v34  ;;  %v295_v50 = vadd.f32 %v294_v40, %v280_v44  ;;  %v220_v52 = vadd.f32 %v219_v47, %v3443_v43  ;;  %v2902_v56 = vpop.f32.mrb[14].mxu0  ;;  %v98_v41 = vld [vmem:[#allocation2 + $0x1] ss:$0 sm:$0xff] }
 0x12f   :  { %v231_v58 = vadd.f32 %v2902_v56, %v3443_v43  ;;  %v222_v59 = vpop.f32.mrb[15].mxu0  ;;  %v3521_v0 = vmax.f32 %v228_v46, 0.0  ;;  %v99_v46 = vld [vmem:[#allocation2 + $0x2] ss:$0 sm:$0xff] }
 0x130   :  { %v296_v60 = vadd.f32 %v295_v50, %v281_v48  ;;  %v246_v61 = vmax.f32 %v220_v52, 0.0  ;;  %v260_v62 = vadd.f32 %v259_v49, %v3506_v39  ;;  %v223_v63 = vadd.f32 %v222_v59, %v3443_v43 }
 0x131   :  { %v3523_v6 = vmax.f32 %v231_v58, 0.0  ;;  %v285_v11 = vmul.f32 %v3521_v0, %v3521_v0 }
 0x132   :  { %v261_v1 = vadd.f32 %v260_v62, %v246_v61  ;;  %v283_v2 = vmul.f32 %v246_v61, %v246_v61  ;;  %v297_v3 = vadd.f32 %v296_v60, %v282_v57  ;;  %v247_v4 = vmax.f32 %v223_v63, 0.0 }
 0x133   :  { %v286_v43 = vmul.f32 %v3523_v6, %v3523_v6 }
 0x134   :  { %v298_v5 = vadd.f32 %v297_v3, %v283_v2  ;;  %v262_v8 = vadd.f32 %v261_v1, %v247_v4  ;;  %v284_v9 = vmul.f32 %v247_v4, %v247_v4 }
 0x136   :  { %v263_v12 = vadd.f32 %v262_v8, %v3521_v0  ;;  %v299_v13 = vadd.f32 %v298_v5, %v284_v9 }
 0x138   :  { %v264_v16 = vadd.f32 %v263_v12, %v3523_v6  ;;  %v300_v17 = vadd.f32 %v299_v13, %v285_v11 }
 0x13a   :  { %v265_v18 = vrot.slane %v264_v16, 4  ;;  %v301_v19 = vadd.f32 %v300_v17, %v286_v43 }
 0x13c   :  { %v266_v20 = vadd.f32 %v265_v18, %v264_v16  ;;  %v302_v21 = vrot.slane %v301_v19, 4 }
 0x13e   :  { %v267_v22 = vrot.slane %v266_v20, 2  ;;  %v303_v23 = vadd.f32 %v302_v21, %v301_v19 }
 0x140   :  { %v268_v24 = vadd.f32 %v267_v22, %v266_v20  ;;  %v304_v25 = vrot.slane %v303_v23, 2  ;;  %v2959_v22 = vld [vmem:[#allocation5 + $0x8] ss:$16 sps:$4 sm:$0xff]  }
 0x142   :  { %v269_v26 = vrot.slane %v268_v24, 1  ;;  %v305_v27 = vadd.f32 %v304_v25, %v303_v23  ;;  %v2962_v23 = vld [vmem:[#allocation5] ss:$16 sps:$4 sm:$0xff]   ;;  %v2970_v25 = vld [vmem:[#allocation5 + $0x24] ss:$16 sps:$4 sm:$0xff]  }
 0x144   :  { %v270_v28 = vadd.f32 %v269_v26, %v268_v24  ;;  %v306_v29 = vrot.slane %v305_v27, 1  ;;  %v2967_v24 = vld [vmem:[#allocation5 + $0x2c] ss:$16 sps:$4 sm:$0xff]   ;;  %v2965_v26 = vld [vmem:[#allocation5 + $0x28] ss:$16 sps:$4 sm:$0xff]  }
 0x146   :  { %v307_v30 = vadd.f32 %v306_v29, %v305_v27  ;;  %v308_v32 = vmul.f32 0.0078125, %v270_v28  ;;  %v2968_v27 = vld [vmem:[#allocation5 + $0x20] ss:$16 sps:$4 sm:$0xff]   ;;  %v2973_v28 = vld [vmem:[#allocation5 + $0x4c] ss:$16 sps:$4 sm:$0xff]  }
 0x147   :  { %v2976_v29 = vld [vmem:[#allocation5 + $0x44] ss:$16 sps:$4 sm:$0xff]  }
 0x148   :  { %v309_v33 = vmul.f32 0.0078125, %v307_v30  ;;  %v310_v35 = vmul.f32 %v308_v32, %v308_v32  ;;  %v2974_v30 = vld [vmem:[#allocation5 + $0x40] ss:$16 sps:$4 sm:$0xff]  }
 0x14a   :  { %v311_v36 = vsub.f32 %v309_v33, %v310_v35  ;;  %v2982_v33 = vld [vmem:[#allocation5 + $0x64] ss:$16 sps:$4 sm:$0xff]   ;;  %v2977_v35 = vld [vmem:[#allocation5 + $0x68] ss:$16 sps:$4 sm:$0xff]  }
 0x14c   :  { %v312_v37 = vmax.f32 %v311_v36, 0.0  ;;  %v2980_v36 = vld [vmem:[#allocation5 + $0x60] ss:$16 sps:$4 sm:$0xff]  }
 0x14e   :  { %v313_v40 = vadd.f32 1e-05, %v312_v37  ;;  %v2985_v37 = vld [vmem:[#allocation5 + $0x8c] ss:$16 sps:$4 sm:$0xff]  }
 0x150   :  { %3087 = vrsqrt.f32 %v313_v40  ;;  %v2988_v40 = vld [vmem:[#allocation5 + $0x84] ss:$16 sps:$4 sm:$0xff]  }
 0x15a   :  { %v3088_v44 = vpop.eup %3087 }
 0x15b   :  { %v315_v45 = vmul.f32 %v3088_v44, %v98_v41  ;;  %v2983_v41 = vld [vmem:[#allocation5 + $0x88] ss:$16 sps:$4 sm:$0xff]   ;;  %v2986_v44 = vld [vmem:[#allocation5 + $0x80] ss:$16 sps:$4 sm:$0xff]  }
 0x15d   :  { %v316_v47 = vmul.f32 %v315_v45, %v308_v32  ;;  %v331_v48 = vmul.f32 %v315_v45, %v247_v4  ;;  %v318_v49 = vmul.f32 %v315_v45, %v3448_v51  ;;  %v319_v50 = vmul.f32 %v315_v45, %v3453_v54  ;;  %v2979_v32 = vld [vmem:[#allocation5 + $0x6c] ss:$16 sps:$4 sm:$0xff]  }
 0x15e   :  { %v320_v52 = vmul.f32 %v315_v45, %v3451_v53  ;;  %v321_v56 = vmul.f32 %v315_v45, %v3455_v55  ;;  %v322_v57 = vmul.f32 %v315_v45, %v3471_v7  ;;  %v323_v58 = vmul.f32 %v315_v45, %v3480_v14 }
 0x15f   :  { %v317_v59 = vsub.f32 %v99_v46, %v316_v47  ;;  %v324_v60 = vmul.f32 %v315_v45, %v3475_v10  ;;  %v325_v62 = vmul.f32 %v315_v45, %v3482_v15  ;;  %v326_v63 = vmul.f32 %v315_v45, %v3495_v31  ;;  %v2994_v46 = vld [vmem:[#allocation5 + $0xa4] ss:$16 sps:$4 sm:$0xff]   ;;  %v2989_v47 = vld [vmem:[#allocation5 + $0xa8] ss:$16 sps:$4 sm:$0xff]  }
 0x160   :  { %v327_v1 = vmul.f32 %v315_v45, %v3504_v38  ;;  %v328_v51 = vmul.f32 %v315_v45, %v3499_v34  ;;  %v329_v54 = vmul.f32 %v315_v45, %v3506_v39  ;;  %v330_v53 = vmul.f32 %v315_v45, %v246_v61 }
 0x161   :  { %v334_v2 = vadd.f32 %v318_v49, %v317_v59  ;;  %v335_v55 = vadd.f32 %v319_v50, %v317_v59  ;;  %v336_v3 = vadd.f32 %v320_v52, %v317_v59  ;;  %v337_v7 = vadd.f32 %v321_v56, %v317_v59  ;;  %v2997_v49 = vld [vmem:[#allocation5 + $0xcc] ss:$16 sps:$4 sm:$0xff]   ;;  %v3000_v50 = vld [vmem:[#allocation5 + $0xc4] ss:$16 sps:$4 sm:$0xff]   ;;  %v2995_v52 = vld [vmem:[#allocation5 + $0xc8] ss:$16 sps:$4 sm:$0xff]  }
 0x162   :  { %v338_v4 = vadd.f32 %v322_v57, %v317_v59  ;;  %v339_v14 = vadd.f32 %v323_v58, %v317_v59  ;;  %v340_v5 = vadd.f32 %v324_v60, %v317_v59  ;;  %v341_v8 = vadd.f32 %v325_v62, %v317_v59  ;;  %v2998_v56 = vld [vmem:[#allocation5 + $0xc0] ss:$16 sps:$4 sm:$0xff]   ;;  %v3003_v57 = vld [vmem:[#allocation5 + $0xec] ss:$16 sps:$4 sm:$0xff]   ;;  %v3006_v58 = vld [vmem:[#allocation5 + $0xe4] ss:$16 sps:$4 sm:$0xff]  }
 0x163   :  { %v350_v10 = vpack.c.bf16 %v335_v55, %v334_v2  ;;  %v351_v9 = vpack.c.bf16 %v337_v7, %v336_v3  ;;  %v342_v15 = vadd.f32 %v326_v63, %v317_v59  ;;  %v343_v11 = vadd.f32 %v327_v1, %v317_v59  ;;  %v3004_v60 = vld [vmem:[#allocation5 + $0xe0] ss:$16 sps:$4 sm:$0xff]   ;;  %v3009_v62 = vld [vmem:[#allocation5 + $0x10c] ss:$16 sps:$4 sm:$0xff]   ;;  %v3012_v63 = vld [vmem:[#allocation5 + $0x104] ss:$16 sps:$4 sm:$0xff]  }
 0x164   :  { %v352_v31 = vpack.c.bf16 %v339_v14, %v338_v4  ;;  %v353_v12 = vpack.c.bf16 %v341_v8, %v340_v5  ;;  %v344_v38 = vadd.f32 %v328_v51, %v317_v59  ;;  %v345_v13 = vadd.f32 %v329_v54, %v317_v59  ;;  %v3007_v1 = vld [vmem:[#allocation5 + $0x108] ss:$16 sps:$4 sm:$0xff]   ;;  %v3010_v51 = vld [vmem:[#allocation5 + $0x100] ss:$16 sps:$4 sm:$0xff]   ;;  %v3015_v54 = vld [vmem:[#allocation5 + $0x12c] ss:$16 sps:$4 sm:$0xff]  }
 0x165   :  { %504 = vmatmul.mubr.bf16.vlgmr.msra.gmra.mrb[0].mxu1 %v350_v10  ;;  %v354_v34 = vpack.c.bf16 %v343_v11, %v342_v15  ;;  %v346_v39 = vadd.f32 %v330_v53, %v317_v59  ;;  %v347_v61 = vadd.f32 %v331_v48, %v317_v59  ;;  %v332_v43 = vmul.f32 %v315_v45, %v3521_v0  ;;  %v2961_v0 = vld [vmem:[#allocation5 + $0xc] ss:$16 sps:$4 sm:$0xff]   ;;  %v2992_v48 = vld [vmem:[#allocation5 + $0xa0] ss:$16 sps:$4 sm:$0xff]   ;;  %v3018_v53 = vld [vmem:[#allocation5 + $0x124] ss:$16 sps:$4 sm:$0xff]  }
 0x166   :  { %513 = vmatprep.mubr.bf16.mxu1 %v3251_v42  ;;  %v355_v16 = vpack.c.bf16 %v345_v13, %v344_v38  ;;  %v333_v17 = vmul.f32 %v315_v45, %v3523_v6  ;;  %v2964_v6 = vld [vmem:[#allocation5 + $0x4] ss:$16 sps:$4 sm:$0xff]   ;;  %1412 = vmatprep.subr.bf16.mxu1 %v2961_v0  ;;  %v2991_v45 = vld [vmem:[#allocation5 + $0xac] ss:$16 sps:$4 sm:$0xff]   ;;  %v3013_v2 = vld [vmem:[#allocation5 + $0x128] ss:$16 sps:$4 sm:$0xff]  }
 0x167   :  { %v356_v18 = vpack.c.bf16 %v347_v61, %v346_v39  ;;  %v348_v19 = vadd.f32 %v332_v43, %v317_v59  ;;  %1299 = vmatprep.subr.bf16.mxu0 %v2964_v6  ;;  %1413 = vmatpush1.bf16.msra.mxu1 %v2959_v22  ;;  %v3016_v55 = vld [vmem:[#allocation5 + $0x120] ss:$16 sps:$4 sm:$0xff]   ;;  %v3021_v3 = vld [vmem:[#allocation5 + $0x14c] ss:$16 sps:$4 sm:$0xff]   ;;  %v3024_v7 = vld [vmem:[#allocation5 + $0x144] ss:$16 sps:$4 sm:$0xff]  }
 0x168   :  { %v349_v20 = vadd.f32 %v333_v17, %v317_v59  ;;  %1300 = vmatpush1.bf16.msra.mxu0 %v2962_v23  ;;  %1414 = vmatprep.subr.bf16.mxu1 %v2967_v24  ;;  %v3001_v59 = vld [vmem:[#allocation5 + $0xe8] ss:$16 sps:$4 sm:$0xff]   ;;  %v3022_v14 = vld [vmem:[#allocation5 + $0x140] ss:$16 sps:$4 sm:$0xff]   ;;  %v3027_v5 = vld [vmem:[#allocation5 + $0x16c] ss:$16 sps:$4 sm:$0xff]  }
 0x169   :  { %1301 = vmatprep.subr.bf16.mxu0 %v2970_v25  ;;  %v3019_v4 = vld [vmem:[#allocation5 + $0x148] ss:$16 sps:$4 sm:$0xff]   ;;  %v3030_v8 = vld [vmem:[#allocation5 + $0x164] ss:$16 sps:$4 sm:$0xff]   ;;  %v3033_v15 = vld [vmem:[#allocation5 + $0x18c] ss:$16 sps:$4 sm:$0xff]  }
 0x16a   :  { %v357_v21 = vpack.c.bf16 %v349_v20, %v348_v19  ;;  %v3025_v10 = vld [vmem:[#allocation5 + $0x168] ss:$16 sps:$4 sm:$0xff]   ;;  %v3036_v11 = vld [vmem:[#allocation5 + $0x184] ss:$16 sps:$4 sm:$0xff]   ;;  %v3039_v38 = vld [vmem:[#allocation5 + $0x1ac] ss:$16 sps:$4 sm:$0xff]  }
 0x16b   :  { %1415 = vmatpush1.bf16.msra.mxu1 %v2965_v26  ;;  %v3037_v13 = vld [vmem:[#allocation5 + $0x1a8] ss:$16 sps:$4 sm:$0xff]   ;;  %v3042_v39 = vld [vmem:[#allocation5 + $0x1a4] ss:$16 sps:$4 sm:$0xff]   ;;  %v3045_v61 = vld [vmem:[#allocation5 + $0x1cc] ss:$16 sps:$4 sm:$0xff]  }
 0x16c   :  { %1302 = vmatpush1.bf16.msra.mxu0 %v2968_v27  ;;  %1416 = vmatprep.subr.bf16.mxu1 %v2973_v28  ;;  %v3048_v43 = vld [vmem:[#allocation5 + $0x1c4] ss:$16 sps:$4 sm:$0xff]   ;;  %v3046_v17 = vld [vmem:[#allocation5 + $0x1c0] ss:$16 sps:$4 sm:$0xff]   ;;  %v3051_v19 = vld [vmem:[#allocation5 + $0x1ec] ss:$16 sps:$4 sm:$0xff]  }
 0x16d   :  { %514 = vmatmul.mubr.bf16.gmra.mrb[4].mxu1 %v351_v9  ;;  %1303 = vmatprep.subr.bf16.mxu0 %v2976_v29  ;;  %v3028_v9 = vld [vmem:[#allocation5 + $0x160] ss:$16 sps:$4 sm:$0xff]   ;;  %v3054_v20 = vld [vmem:[#allocation5 + $0x1e4] ss:$16 sps:$4 sm:$0xff]   ;;  %v3049_v0 = vld [vmem:[#allocation5 + $0x1e8] ss:$16 sps:$4 sm:$0xff]  }
 0x16e   :  { %523 = vmatprep.mubr.bf16.mxu1 %v3251_v42  ;;  %v3052_v6 = vld [vmem:[#allocation5 + $0x1e0] ss:$16 sps:$4 sm:$0xff]  }
 0x16f   :  { %v375_v27 = vld [vmem:[#allocation2 + $0x3] ss:$8 sm:$0x3] }
 0x170   :  { %1304 = vmatpush1.bf16.msra.mxu0 %v2974_v30 }
 0x171   :  { %1305 = vmatprep.subr.bf16.mxu0 %v2982_v33 }
 0x174   :  { %1306 = vmatpush1.bf16.msra.mxu0 %v2980_v36 }
 0x175   :  { %524 = vmatmul.mubr.bf16.gmra.mrb[8].mxu1 %v352_v31  ;;  %1307 = vmatprep.subr.bf16.mxu0 %v2988_v40  ;;  %v3031_v31 = vld [vmem:[#allocation5 + $0x188] ss:$16 sps:$4 sm:$0xff]  }
 0x176   :  { %533 = vmatprep.mubr.bf16.mxu1 %v3251_v42 }
 0x178   :  { %1308 = vmatpush1.bf16.msra.mxu0 %v2986_v44 }
 0x179   :  { %1309 = vmatprep.subr.bf16.mxu0 %v2994_v46 }
 0x17c   :  { %1310 = vmatpush1.bf16.msra.mxu0 %v2992_v48 }
 0x17d   :  { %534 = vmatmul.mubr.bf16.gmra.mrb[12].mxu1 %v353_v12  ;;  %1311 = vmatprep.subr.bf16.mxu0 %v3000_v50  ;;  %v3034_v12 = vld [vmem:[#allocation5 + $0x180] ss:$16 sps:$4 sm:$0xff]  }
 0x17e   :  { %543 = vmatprep.mubr.bf16.mxu1 %v3251_v42 }
 0x180   :  { %1312 = vmatpush1.bf16.msra.mxu0 %v2998_v56 }
 0x181   :  { %1313 = vmatprep.subr.bf16.mxu0 %v3006_v58 }
 0x184   :  { %1314 = vmatpush1.bf16.msra.mxu0 %v3004_v60 }
 0x185   :  { %544 = vmatmul.mubr.bf16.gmra.mrb[16].mxu1 %v354_v34  ;;  %1315 = vmatprep.subr.bf16.mxu0 %v3012_v63  ;;  %v3040_v34 = vld [vmem:[#allocation5 + $0x1a0] ss:$16 sps:$4 sm:$0xff]  }
 0x186   :  { %553 = vmatprep.mubr.bf16.mxu1 %v3251_v42 }
 0x188   :  { %1316 = vmatpush1.bf16.msra.mxu0 %v3010_v51 }
 0x189   :  { %1317 = vmatprep.subr.bf16.mxu0 %v3018_v53 }
 0x18c   :  { %1318 = vmatpush1.bf16.msra.mxu0 %v3016_v55 }
 0x18d   :  { %554 = vmatmul.mubr.bf16.gmra.mrb[20].mxu1 %v355_v16  ;;  %1319 = vmatprep.subr.bf16.mxu0 %v3024_v7  ;;  %v3043_v16 = vld [vmem:[#allocation5 + $0x1c8] ss:$16 sps:$4 sm:$0xff]  }
 0x18e   :  { %563 = vmatprep.mubr.bf16.mxu1 %v3251_v42 }
 0x190   :  { %1320 = vmatpush1.bf16.msra.mxu0 %v3022_v14 }
 0x191   :  { %1321 = vmatprep.subr.bf16.mxu0 %v3030_v8 }
 0x194   :  { %1322 = vmatpush1.bf16.msra.mxu0 %v3028_v9 }
 0x195   :  { %564 = vmatmul.mubr.bf16.gmra.mrb[24].mxu1 %v356_v18  ;;  %1323 = vmatprep.subr.bf16.mxu0 %v3036_v11  ;;  %v381_v18 = vlaneseq }
 0x196   :  { %573 = vmatprep.mubr.bf16.mxu1 %v3251_v42  ;;  %v2971_v42 = vld [vmem:[#allocation5 + $0x48] ss:$16 sps:$4 sm:$0xff]  }
 0x197   :  { %1417 = vmatpush1.bf16.msra.mxu1 %v2971_v42  ;;  %v3552_v22 = vshrl.u32 %v381_v18, 7 }
 0x198   :  { %1418 = vmatprep.subr.bf16.mxu1 %v2979_v32  ;;  %1324 = vmatpush1.bf16.msra.mxu0 %v3034_v12 }
 0x199   :  { %1325 = vmatprep.subr.bf16.mxu0 %v3042_v39  ;;  %v3555_v26 = vsub.s32 0, %v3552_v22  ;;  %v3558_v28 = vsub.s32 1, %v3552_v22 }
 0x19b   :  { %1419 = vmatpush1.bf16.msra.mxu1 %v2977_v35  ;;  %v3561_v42 = vrot.slane %v375_v27, %v3555_v26  ;;  %v3564_v32 = vrot.slane %v375_v27, %v3558_v28 }
 0x19c   :  { %1420 = vmatprep.subr.bf16.mxu1 %v2985_v37  ;;  %1326 = vmatpush1.bf16.msra.mxu0 %v3040_v34 }
 0x19d   :  { %574 = vmatmul.mubr.bf16.gmra.mrb[28].mxu1 %v357_v21  ;;  %1327 = vmatprep.subr.bf16.mxu0 %v3048_v43 }
 0x19f   :  { %1421 = vmatpush1.bf16.msra.mxu1 %v2983_v41 }
 0x1a0   :  { %1422 = vmatprep.subr.bf16.mxu1 %v2991_v45  ;;  %1328 = vmatpush1.bf16.msra.mxu0 %v3046_v17 }
 0x1a1   :  { %1329 = vmatprep.subr.bf16.mxu0 %v3054_v20 }
 0x1a3   :  { %1423 = vmatpush1.bf16.msra.mxu1 %v2989_v47 }
 0x1a4   :  { %1424 = vmatprep.subr.bf16.mxu1 %v2997_v49  ;;  %1330 = vmatpush1.bf16.msra.mxu0 %v3052_v6 }
 0x1a7   :  { %1425 = vmatpush1.bf16.msra.mxu1 %v2995_v52 }
 0x1a8   :  { %1426 = vmatprep.subr.bf16.mxu1 %v3003_v57 }
 0x1ab   :  { %1427 = vmatpush1.bf16.msra.mxu1 %v3001_v59 }
 0x1ac   :  { %1428 = vmatprep.subr.bf16.mxu1 %v3009_v62 }
 0x1af   :  { %1429 = vmatpush1.bf16.msra.mxu1 %v3007_v1 }
 0x1b0   :  { %1430 = vmatprep.subr.bf16.mxu1 %v3015_v54 }
 0x1b3   :  { %1431 = vmatpush1.bf16.msra.mxu1 %v3013_v2 }
 0x1b4   :  { %1432 = vmatprep.subr.bf16.mxu1 %v3021_v3 }
 0x1b7   :  { %1433 = vmatpush1.bf16.msra.mxu1 %v3019_v4 }
 0x1b8   :  { %1434 = vmatprep.subr.bf16.mxu1 %v3027_v5 }
 0x1bb   :  { %1435 = vmatpush1.bf16.msra.mxu1 %v3025_v10 }
 0x1bc   :  { %1436 = vmatprep.subr.bf16.mxu1 %v3033_v15 }
 0x1bf   :  { %1437 = vmatpush1.bf16.msra.mxu1 %v3031_v31 }
 0x1c0   :  { %1438 = vmatprep.subr.bf16.mxu1 %v3039_v38 }
 0x1c3   :  { %1439 = vmatpush1.bf16.msra.mxu1 %v3037_v13 }
 0x1c4   :  { %1440 = vmatprep.subr.bf16.mxu1 %v3045_v61 }
 0x1c7   :  { %1441 = vmatpush1.bf16.msra.mxu1 %v3043_v16 }
 0x1c8   :  { %1442 = vmatprep.subr.bf16.mxu1 %v3051_v19 }
 0x1cb   :  { %1443 = vmatpush1.bf16.msra.mxu1 %v3049_v0 }
 0x238   :  { %v505_v21 = vpop.f32.mrb[0].mxu1 }
 0x239   :  { %v507_v23 = vpop.f32.mrb[1].mxu1  ;;  %v506_v40 = vadd.f32 %v505_v21, %v3561_v42 }
 0x23a   :  { %v509_v24 = vpop.f32.mrb[2].mxu1  ;;  %v508_v44 = vadd.f32 %v507_v23, %v3564_v32 }
 0x23b   :  { %v511_v25 = vpop.f32.mrb[3].mxu1  ;;  %v510_v35 = vadd.f32 %v509_v24, %v3561_v42  ;;  %v3576_v49 = vmax.f32 %v506_v40, 0.0 }
 0x23c   :  { %v512_v37 = vadd.f32 %v511_v25, %v3564_v32  ;;  %v3581_v57 = vmax.f32 %v508_v44, 0.0 }
 0x23d   :  { %v3572_v46 = vmax.f32 %v510_v35, 0.0  ;;  %v658_v53 = vmul.f32 %v3576_v49, %v3576_v49 }
 0x23e   :  { %v3574_v47 = vmax.f32 %v512_v37, 0.0  ;;  %v659_v7 = vmul.f32 %v3581_v57, %v3581_v57 }
 0x23f   :  { %v660_v62 = vmul.f32 %v3572_v46, %v3572_v46  ;;  %v616_v2 = vadd.f32 %v3572_v46, %v3576_v49 }
 0x240   :  { %v515_v29 = vpop.f32.mrb[4].mxu1  ;;  %v661_v51 = vmul.f32 %v3574_v47, %v3574_v47  ;;  %v637_v4 = vadd.f32 %v3574_v47, %v3581_v57 }
 0x241   :  { %v517_v30 = vpop.f32.mrb[5].mxu1  ;;  %v516_v41 = vadd.f32 %v515_v29, %v3561_v42  ;;  %v690_v8 = vadd.f32 %v660_v62, %v658_v53 }
 0x242   :  { %v519_v33 = vpop.f32.mrb[6].mxu1  ;;  %v518_v45 = vadd.f32 %v517_v30, %v3564_v32  ;;  %v711_v11 = vadd.f32 %v661_v51, %v659_v7 }
 0x243   :  { %v521_v36 = vpop.f32.mrb[7].mxu1  ;;  %v3578_v50 = vmax.f32 %v516_v41, 0.0  ;;  %v520_v52 = vadd.f32 %v519_v33, %v3561_v42 }
 0x244   :  { %v3583_v58 = vmax.f32 %v518_v45, 0.0  ;;  %v522_v59 = vadd.f32 %v521_v36, %v3564_v32 }
 0x245   :  { %v662_v55 = vmul.f32 %v3578_v50, %v3578_v50  ;;  %v3598_v3 = vmax.f32 %v520_v52, 0.0  ;;  %v617_v10 = vadd.f32 %v616_v2, %v3578_v50 }
 0x246   :  { %v663_v14 = vmul.f32 %v3583_v58, %v3583_v58  ;;  %v3606_v5 = vmax.f32 %v522_v59, 0.0  ;;  %v638_v31 = vadd.f32 %v637_v4, %v3583_v58 }
 0x247   :  { %v691_v34 = vadd.f32 %v690_v8, %v662_v55  ;;  %v664_v39 = vmul.f32 %v3598_v3, %v3598_v3  ;;  %v618_v20 = vadd.f32 %v617_v10, %v3598_v3 }
 0x248   :  { %v525_v48 = vpop.f32.mrb[8].mxu1  ;;  %v712_v16 = vadd.f32 %v711_v11, %v663_v14  ;;  %v665_v17 = vmul.f32 %v3606_v5, %v3606_v5  ;;  %v639_v23 = vadd.f32 %v638_v31, %v3606_v5 }
 0x249   :  { %v527_v56 = vpop.f32.mrb[9].mxu1  ;;  %v526_v63 = vadd.f32 %v525_v48, %v3561_v42  ;;  %v692_v27 = vadd.f32 %v691_v34, %v664_v39 }
 0x24a   :  { %v529_v60 = vpop.f32.mrb[10].mxu1  ;;  %v528_v54 = vadd.f32 %v527_v56, %v3564_v32  ;;  %v713_v35 = vadd.f32 %v712_v16, %v665_v17 }
 0x24b   :  { %v531_v1 = vpop.f32.mrb[11].mxu1  ;;  %v3609_v9 = vmax.f32 %v526_v63, 0.0  ;;  %v530_v15 = vadd.f32 %v529_v60, %v3561_v42 }
 0x24c   :  { %v3613_v12 = vmax.f32 %v528_v54, 0.0  ;;  %v532_v38 = vadd.f32 %v531_v1, %v3564_v32 }
 0x24d   :  { %v666_v21 = vmul.f32 %v3609_v9, %v3609_v9  ;;  %v3625_v0 = vmax.f32 %v530_v15, 0.0  ;;  %v619_v29 = vadd.f32 %v618_v20, %v3609_v9 }
 0x24e   :  { %v667_v24 = vmul.f32 %v3613_v12, %v3613_v12  ;;  %v3630_v25 = vmax.f32 %v532_v38, 0.0  ;;  %v640_v36 = vadd.f32 %v639_v23, %v3613_v12 }
 0x24f   :  { %v693_v41 = vadd.f32 %v692_v27, %v666_v21  ;;  %v668_v44 = vmul.f32 %v3625_v0, %v3625_v0  ;;  %v620_v56 = vadd.f32 %v619_v29, %v3625_v0 }
 0x250   :  { %v535_v13 = vpop.f32.mrb[12].mxu1  ;;  %v714_v45 = vadd.f32 %v713_v35, %v667_v24  ;;  %v669_v48 = vmul.f32 %v3630_v25, %v3630_v25  ;;  %v641_v1 = vadd.f32 %v640_v36, %v3630_v25 }
 0x251   :  { %v536_v61 = vadd.f32 %v535_v13, %v3561_v42  ;;  %v537_v43 = vpop.f32.mrb[13].mxu1  ;;  %v694_v55 = vadd.f32 %v693_v41, %v668_v44 }
 0x252   :  { %v538_v18 = vadd.f32 %v537_v43, %v3564_v32  ;;  %v539_v19 = vpop.f32.mrb[14].mxu1  ;;  %v715_v10 = vadd.f32 %v714_v45, %v669_v48 }
 0x253   :  { %v541_v6 = vpop.f32.mrb[15].mxu1  ;;  %v3633_v30 = vmax.f32 %v536_v61, 0.0  ;;  %v540_v33 = vadd.f32 %v539_v19, %v3561_v42 }
 0x254   :  { %v3637_v37 = vmax.f32 %v538_v18, 0.0  ;;  %v542_v40 = vadd.f32 %v541_v6, %v3564_v32 }
 0x255   :  { %v670_v59 = vmul.f32 %v3633_v30, %v3633_v30  ;;  %v3647_v60 = vmax.f32 %v540_v33, 0.0  ;;  %v621_v7 = vadd.f32 %v620_v56, %v3633_v30 }
 0x256   :  { %v671_v51 = vmul.f32 %v3637_v37, %v3637_v37  ;;  %v3653_v54 = vmax.f32 %v542_v40, 0.0  ;;  %v642_v15 = vadd.f32 %v641_v1, %v3637_v37 }
 0x257   :  { %v695_v38 = vadd.f32 %v694_v55, %v670_v59  ;;  %v672_v13 = vmul.f32 %v3647_v60, %v3647_v60  ;;  %v622_v61 = vadd.f32 %v621_v7, %v3647_v60 }
 0x258   :  { %v545_v52 = vpop.f32.mrb[16].mxu1  ;;  %v716_v34 = vadd.f32 %v715_v10, %v671_v51  ;;  %v673_v39 = vmul.f32 %v3653_v54, %v3653_v54  ;;  %v643_v17 = vadd.f32 %v642_v15, %v3653_v54 }
 0x259   :  { %v546_v62 = vadd.f32 %v545_v52, %v3561_v42  ;;  %v547_v63 = vpop.f32.mrb[17].mxu1  ;;  %v696_v21 = vadd.f32 %v695_v38, %v672_v13 }
 0x25a   :  { %v548_v53 = vadd.f32 %v547_v63, %v3564_v32  ;;  %v549_v2 = vpop.f32.mrb[18].mxu1  ;;  %v717_v27 = vadd.f32 %v716_v34, %v673_v39 }
 0x25b   :  { %v3657_v4 = vmax.f32 %v546_v62, 0.0  ;;  %v550_v14 = vadd.f32 %v549_v2, %v3561_v42  ;;  %v551_v8 = vpop.f32.mrb[19].mxu1 }
 0x25c   :  { %v3661_v11 = vmax.f32 %v548_v53, 0.0  ;;  %v552_v31 = vadd.f32 %v551_v8, %v3564_v32 }
 0x25d   :  { %v674_v43 = vmul.f32 %v3657_v4, %v3657_v4  ;;  %v3671_v16 = vmax.f32 %v550_v14, 0.0  ;;  %v623_v6 = vadd.f32 %v622_v61, %v3657_v4 }
 0x25e   :  { %v675_v18 = vmul.f32 %v3661_v11, %v3661_v11  ;;  %v3676_v19 = vmax.f32 %v552_v31, 0.0  ;;  %v644_v29 = vadd.f32 %v643_v17, %v3661_v11 }
 0x25f   :  { %v697_v36 = vadd.f32 %v696_v21, %v674_v43  ;;  %v676_v40 = vmul.f32 %v3671_v16, %v3671_v16  ;;  %v624_v62 = vadd.f32 %v623_v6, %v3671_v16 }
 0x260   :  { %v555_v20 = vpop.f32.mrb[20].mxu1  ;;  %v718_v48 = vadd.f32 %v717_v27, %v675_v18  ;;  %v677_v52 = vmul.f32 %v3676_v19, %v3676_v19  ;;  %v645_v51 = vadd.f32 %v644_v29, %v3676_v19 }
 0x261   :  { %v556_v23 = vadd.f32 %v555_v20, %v3561_v42  ;;  %v557_v24 = vpop.f32.mrb[21].mxu1  ;;  %v698_v55 = vadd.f32 %v697_v36, %v676_v40 }
 0x262   :  { %v558_v33 = vadd.f32 %v557_v24, %v3564_v32  ;;  %v559_v35 = vpop.f32.mrb[22].mxu1  ;;  %v719_v14 = vadd.f32 %v718_v48, %v677_v52 }
 0x263   :  { %v3684_v41 = vmax.f32 %v556_v23, 0.0  ;;  %v560_v44 = vadd.f32 %v559_v35, %v3561_v42  ;;  %v561_v45 = vpop.f32.mrb[23].mxu1 }
 0x264   :  { %v3689_v56 = vmax.f32 %v558_v33, 0.0  ;;  %v562_v59 = vadd.f32 %v561_v45, %v3564_v32 }
 0x265   :  { %v678_v63 = vmul.f32 %v3684_v41, %v3684_v41  ;;  %v3695_v1 = vmax.f32 %v560_v44, 0.0  ;;  %v625_v7 = vadd.f32 %v624_v62, %v3684_v41 }
 0x266   :  { %v679_v53 = vmul.f32 %v3689_v56, %v3689_v56  ;;  %v3700_v2 = vmax.f32 %v562_v59, 0.0  ;;  %v646_v8 = vadd.f32 %v645_v51, %v3689_v56 }
 0x267   :  { %v699_v15 = vadd.f32 %v698_v55, %v678_v63  ;;  %v680_v31 = vmul.f32 %v3695_v1, %v3695_v1  ;;  %v626_v17 = vadd.f32 %v625_v7, %v3695_v1 }
 0x268   :  { %v565_v10 = vpop.f32.mrb[24].mxu1  ;;  %v720_v34 = vadd.f32 %v719_v14, %v679_v53  ;;  %v681_v39 = vmul.f32 %v3700_v2, %v3700_v2  ;;  %v647_v6 = vadd.f32 %v646_v8, %v3700_v2 }
 0x269   :  { %v566_v38 = vadd.f32 %v565_v10, %v3561_v42  ;;  %v567_v13 = vpop.f32.mrb[25].mxu1  ;;  %v700_v27 = vadd.f32 %v699_v15, %v680_v31 }
 0x26a   :  { %v568_v61 = vadd.f32 %v567_v13, %v3564_v32  ;;  %v569_v43 = vpop.f32.mrb[26].mxu1  ;;  %v721_v36 = vadd.f32 %v720_v34, %v681_v39 }
 0x26b   :  { %v3711_v18 = vmax.f32 %v566_v38, 0.0  ;;  %v570_v20 = vadd.f32 %v569_v43, %v3561_v42  ;;  %v571_v21 = vpop.f32.mrb[27].mxu1 }
 0x26c   :  { %v3715_v23 = vmax.f32 %v568_v61, 0.0  ;;  %v572_v24 = vadd.f32 %v571_v21, %v3564_v32 }
 0x26d   :  { %v627_v29 = vadd.f32 %v626_v17, %v3711_v18  ;;  %v682_v33 = vmul.f32 %v3711_v18, %v3711_v18  ;;  %v3721_v35 = vmax.f32 %v570_v20, 0.0 }
 0x26e   :  { %v648_v40 = vadd.f32 %v647_v6, %v3715_v23  ;;  %v683_v44 = vmul.f32 %v3715_v23, %v3715_v23  ;;  %v3726_v45 = vmax.f32 %v572_v24, 0.0 }
 0x26f   :  { %v701_v48 = vadd.f32 %v700_v27, %v682_v33  ;;  %v628_v52 = vadd.f32 %v627_v29, %v3721_v35  ;;  %v684_v59 = vmul.f32 %v3721_v35, %v3721_v35 }
 0x270   :  { %v722_v62 = vadd.f32 %v721_v36, %v683_v44  ;;  %v649_v63 = vadd.f32 %v648_v40, %v3726_v45  ;;  %v685_v51 = vmul.f32 %v3726_v45, %v3726_v45  ;;  %v575_v53 = vpop.f32.mrb[28].mxu1 }
 0x271   :  { %v702_v55 = vadd.f32 %v701_v48, %v684_v59  ;;  %v576_v7 = vadd.f32 %v575_v53, %v3561_v42  ;;  %v577_v14 = vpop.f32.mrb[29].mxu1 }
 0x272   :  { %v723_v8 = vadd.f32 %v722_v62, %v685_v51  ;;  %v578_v10 = vadd.f32 %v577_v14, %v3564_v32  ;;  %v579_v15 = vpop.f32.mrb[30].mxu1 }
 0x273   :  { %v3736_v31 = vmax.f32 %v576_v7, 0.0  ;;  %v580_v38 = vadd.f32 %v579_v15, %v3561_v42  ;;  %v581_v13 = vpop.f32.mrb[31].mxu1 }
 0x274   :  { %v3739_v34 = vmax.f32 %v578_v10, 0.0  ;;  %v582_v39 = vadd.f32 %v581_v13, %v3564_v32 }
 0x275   :  { %v629_v61 = vadd.f32 %v628_v52, %v3736_v31  ;;  %v686_v43 = vmul.f32 %v3736_v31, %v3736_v31  ;;  %v3745_v17 = vmax.f32 %v580_v38, 0.0 }
 0x276   :  { %v650_v20 = vadd.f32 %v649_v63, %v3739_v34  ;;  %v687_v21 = vmul.f32 %v3739_v34, %v3739_v34  ;;  %v615_v6 = vmax.f32 %v582_v39, 0.0 }
 0x277   :  { %v703_v24 = vadd.f32 %v702_v55, %v686_v43  ;;  %v630_v42 = vadd.f32 %v629_v61, %v3745_v17  ;;  %v688_v27 = vmul.f32 %v3745_v17, %v3745_v17 }
 0x278   :  { %v724_v32 = vadd.f32 %v723_v8, %v687_v21  ;;  %v651_v29 = vadd.f32 %v650_v20, %v615_v6  ;;  %v689_v33 = vmul.f32 %v615_v6, %v615_v6 }
 0x279   :  { %v631_v36 = vrot.slane %v630_v42, 4  ;;  %v704_v40 = vadd.f32 %v703_v24, %v688_v27 }
 0x27a   :  { %v652_v44 = vrot.slane %v651_v29, 4  ;;  %v725_v48 = vadd.f32 %v724_v32, %v689_v33 }
 0x27b   :  { %v632_v52 = vadd.f32 %v631_v36, %v630_v42  ;;  %v705_v59 = vrot.slane %v704_v40, 4 }
 0x27c   :  { %v653_v62 = vadd.f32 %v652_v44, %v651_v29  ;;  %v726_v63 = vrot.slane %v725_v48, 4 }
 0x27d   :  { %v633_v51 = vrot.slane %v632_v52, 2  ;;  %v706_v53 = vadd.f32 %v705_v59, %v704_v40 }
 0x27e   :  { %v654_v7 = vrot.slane %v653_v62, 2  ;;  %v727_v55 = vadd.f32 %v726_v63, %v725_v48 }
 0x27f   :  { %v634_v14 = vadd.f32 %v633_v51, %v632_v52  ;;  %v707_v10 = vrot.slane %v706_v53, 2 }
 0x280   :  { %v655_v15 = vadd.f32 %v654_v7, %v653_v62  ;;  %v728_v38 = vrot.slane %v727_v55, 2 }
 0x281   :  { %v635_v13 = vrot.slane %v634_v14, 1  ;;  %v708_v8 = vadd.f32 %v707_v10, %v706_v53  ;;  %v3252_v53 = vmov 1966171168  }
 0x282   :  { %v656_v39 = vrot.slane %v655_v15, 1  ;;  %v729_v61 = vadd.f32 %v728_v38, %v727_v55  ;;  %v750_v7 = vunpack.c.l.s4 %v3252_v53 }
 0x283   :  { %v636_v43 = vadd.f32 %v635_v13, %v634_v14  ;;  %v709_v20 = vrot.slane %v708_v8, 1 }
 0x284   :  { %v657_v21 = vadd.f32 %v656_v39, %v655_v15  ;;  %v730_v24 = vrot.slane %v729_v61, 1  ;;  %v751_v55 = vunpack.c.0.s8 %v750_v7 }
 0x285   :  { %v710_v42 = vadd.f32 %v709_v20, %v708_v8  ;;  %v732_v27 = vmul.f32 0.0078125, %v636_v43  ;;  %v377_v8 = vld [vmem:[#allocation2 + $0x4] ss:$8 sm:$0x3] }
 0x286   :  { %v731_v32 = vadd.f32 %v730_v24, %v729_v61  ;;  %v733_v29 = vmul.f32 0.0078125, %v657_v21  ;;  %v3754_v10 = vsub.s32 %v751_v55, %v3552_v22 }
 0x287   :  { %v734_v33 = vmul.f32 0.0078125, %v710_v42  ;;  %v736_v36 = vmul.f32 %v732_v27, %v732_v27 }
 0x288   :  { %v735_v40 = vmul.f32 0.0078125, %v731_v32  ;;  %v737_v44 = vmul.f32 %v733_v29, %v733_v29 }
 0x289   :  { %v738_v48 = vsub.f32 %v734_v33, %v736_v36 }
 0x28a   :  { %v739_v52 = vsub.f32 %v735_v40, %v737_v44 }
 0x28b   :  { %v740_v59 = vmax.f32 %v738_v48, 0.0 }
 0x28c   :  { %v741_v62 = vmax.f32 %v739_v52, 0.0 }
 0x28d   :  { %v742_v63 = vadd.f32 1e-05, %v740_v59 }
 0x28e   :  { %v743_v51 = vadd.f32 1e-05, %v741_v62 }
 0x28f   :  { %3089 = vrsqrt.f32 %v742_v63 }
 0x290   :  { %3091 = vrsqrt.f32 %v743_v51 }
 0x299   :  { %v3090_v14 = vpop.eup %3089 }
 0x29a   :  { %v3092_v15 = vpop.eup %3091 }
 0x29b   :  { %v748_v38 = vcombine.low %v3090_v14, %v3092_v15 }
 0x29d   :  { %v755_v13 = vrot.slane %v748_v38, %v3754_v10 }
 0x29f   :  { %v762_v39 = vrot.slane %v755_v13, %v3754_v10 }
 0x2a1   :  { %v764_v61 = vmul.f32 %v762_v39, %v377_v8 }
 0x2a3   :  { %v769_v43 = vrot.slane %v764_v61, %v3555_v26  ;;  %v773_v20 = vrot.slane %v764_v61, %v3558_v28 }
 0x2a5   :  { %v776_v21 = vmul.f32 %v769_v43, %v732_v27  ;;  %v777_v24 = vmul.f32 %v773_v20, %v733_v29  ;;  %v3760_v42 = vmul.f32 %v773_v20, %v615_v6  ;;  %v798_v33 = vmul.f32 %v773_v20, %v3581_v57  ;;  %v379_v29 = vld [vmem:[#allocation2 + $0x5] ss:$8 sm:$0x3] }
 0x2a6   :  { %v800_v36 = vmul.f32 %v773_v20, %v3574_v47  ;;  %v797_v40 = vmul.f32 %v769_v43, %v3576_v49  ;;  %v799_v44 = vmul.f32 %v769_v43, %v3572_v46  ;;  %v802_v52 = vmul.f32 %v773_v20, %v3583_v58 }
 0x2a7   :  { %v780_v32 = vcombine.low %v776_v21, %v777_v24  ;;  %v804_v59 = vmul.f32 %v773_v20, %v3606_v5  ;;  %v801_v27 = vmul.f32 %v769_v43, %v3578_v50  ;;  %v803_v6 = vmul.f32 %v769_v43, %v3598_v3 }
 0x2a8   :  { %v806_v62 = vmul.f32 %v773_v20, %v3613_v12  ;;  %v808_v57 = vmul.f32 %v773_v20, %v3630_v25  ;;  %v805_v47 = vmul.f32 %v769_v43, %v3609_v9  ;;  %v807_v46 = vmul.f32 %v769_v43, %v3625_v0 }
 0x2a9   :  { %v787_v48 = vrot.slane %v780_v32, %v3754_v10  ;;  %v810_v63 = vmul.f32 %v773_v20, %v3637_v37  ;;  %v812_v58 = vmul.f32 %v773_v20, %v3653_v54  ;;  %v809_v5 = vmul.f32 %v769_v43, %v3633_v30 }
 0x2aa   :  { %v811_v50 = vmul.f32 %v769_v43, %v3647_v60  ;;  %v822_v3 = vmul.f32 %v773_v20, %v3715_v23  ;;  %v824_v12 = vmul.f32 %v773_v20, %v3726_v45  ;;  %v821_v25 = vmul.f32 %v769_v43, %v3711_v18 }
 0x2ab   :  { %v794_v49 = vrot.slane %v787_v48, %v3754_v10  ;;  %v823_v9 = vmul.f32 %v769_v43, %v3721_v35  ;;  %v826_v53 = vmul.f32 %v773_v20, %v3739_v34  ;;  %v814_v0 = vmul.f32 %v773_v20, %v3661_v11 }
 0x2ac   :  { %v816_v37 = vmul.f32 %v773_v20, %v3676_v19  ;;  %v825_v54 = vmul.f32 %v769_v43, %v3736_v31  ;;  %v827_v30 = vmul.f32 %v769_v43, %v3745_v17  ;;  %v813_v45 = vmul.f32 %v769_v43, %v3657_v4 }
 0x2ad   :  { %v796_v51 = vsub.f32 %v379_v29, %v794_v49  ;;  %v815_v18 = vmul.f32 %v769_v43, %v3671_v16  ;;  %v818_v35 = vmul.f32 %v773_v20, %v3689_v56  ;;  %v820_v34 = vmul.f32 %v773_v20, %v3700_v2 }
 0x2ae   :  { %v817_v11 = vmul.f32 %v769_v43, %v3684_v41  ;;  %v819_v19 = vmul.f32 %v769_v43, %v3695_v1 }
 0x2af   :  { %v833_v60 = vrot.slane %v796_v51, %v3555_v26  ;;  %v837_v23 = vrot.slane %v796_v51, %v3558_v28 }
 0x2b1   :  { %v841_v7 = vadd.f32 %v837_v23, %v798_v33  ;;  %v843_v31 = vadd.f32 %v837_v23, %v800_v36  ;;  %v840_v55 = vadd.f32 %v833_v60, %v797_v40  ;;  %v842_v17 = vadd.f32 %v833_v60, %v799_v44 }
 0x2b2   :  { %v845_v14 = vadd.f32 %v837_v23, %v802_v52  ;;  %v847_v15 = vadd.f32 %v837_v23, %v804_v59  ;;  %v844_v38 = vadd.f32 %v833_v60, %v801_v27  ;;  %v846_v13 = vadd.f32 %v833_v60, %v803_v6 }
 0x2b3   :  { %v873_v8 = vpack.c.bf16 %v843_v31, %v841_v7  ;;  %v872_v4 = vpack.c.bf16 %v842_v17, %v840_v55  ;;  %v849_v39 = vadd.f32 %v837_v23, %v806_v62  ;;  %v851_v16 = vadd.f32 %v837_v23, %v808_v57  ;;  %v3061_v31 = vld [vmem:[#allocation7 + $0x10] sm:$0xff]  }
 0x2b4   :  { %v875_v61 = vpack.c.bf16 %v847_v15, %v845_v14  ;;  %v874_v56 = vpack.c.bf16 %v846_v13, %v844_v38  ;;  %v848_v21 = vadd.f32 %v833_v60, %v805_v47  ;;  %v850_v2 = vadd.f32 %v833_v60, %v807_v46  ;;  %v3070_v55 = vld [vmem:[#allocation7 + $0x90] sm:$0xff]   ;;  %v3063_v15 = vld [vmem:[#allocation7 + $0x58] sm:$0xff]  }
 0x2b5   :  { %1331 = vmatprep.mubr.bf16.mxu0 %v873_v8  ;;  %1444 = vmatprep.mubr.bf16.mxu1 %v873_v8  ;;  %v877_v41 = vpack.c.bf16 %v851_v16, %v849_v39  ;;  %v853_v1 = vadd.f32 %v837_v23, %v810_v63  ;;  %v855_v43 = vadd.f32 %v837_v23, %v812_v58  ;;  %v3072_v38 = vld [vmem:[#allocation7 + $0xd8] sm:$0xff]  }
 0x2b6   :  { %1332 = vmatmul.mubr.bf16.vlgmr.msra.gmra.mrb[16].mxu0 %v872_v4  ;;  %1445 = vmatmul.mubr.bf16.vlgmr.msra.gmra.mrb[32].mxu1 %v872_v4  ;;  %v876_v20 = vpack.c.bf16 %v850_v2, %v848_v21  ;;  %v852_v24 = vadd.f32 %v833_v60, %v809_v5  ;;  %v854_v32 = vadd.f32 %v833_v60, %v811_v50  ;;  %v3065_v8 = vld [vmem:[#allocation7 + $0x18] sm:$0xff]  }
 0x2b7   :  { %1341 = vmatprep.mubr.bf16.mxu0 %v875_v61  ;;  %1454 = vmatprep.mubr.bf16.mxu1 %v875_v61  ;;  %v879_v33 = vpack.c.bf16 %v855_v43, %v853_v1  ;;  %v857_v36 = vadd.f32 %v837_v23, %v814_v0  ;;  %v859_v40 = vadd.f32 %v837_v23, %v816_v37  ;;  %v3074_v4 = vld [vmem:[#allocation7 + $0x98] sm:$0xff]   ;;  %v3076_v1 = vld [vmem:[#allocation7 + $0xe0] sm:$0xff]  }
 0x2b8   :  { %v878_v44 = vpack.c.bf16 %v854_v32, %v852_v24  ;;  %v856_v48 = vadd.f32 %v833_v60, %v813_v45  ;;  %v858_v52 = vadd.f32 %v833_v60, %v815_v18  ;;  %v861_v59 = vadd.f32 %v837_v23, %v818_v35 }
 0x2b9   :  { %v881_v27 = vpack.c.bf16 %v859_v40, %v857_v36  ;;  %v863_v29 = vadd.f32 %v837_v23, %v820_v34  ;;  %v860_v6 = vadd.f32 %v833_v60, %v817_v11  ;;  %v862_v62 = vadd.f32 %v833_v60, %v819_v19  ;;  %v3068_v34 = vld [vmem:[#allocation7 + $0xd0] sm:$0xff]   ;;  %v3078_v36 = vld [vmem:[#allocation7 + $0xa0] sm:$0xff]  }
 0x2ba   :  { %v880_v57 = vpack.c.bf16 %v858_v52, %v856_v48  ;;  %v865_v47 = vadd.f32 %v837_v23, %v822_v3  ;;  %v867_v49 = vadd.f32 %v837_v23, %v824_v12  ;;  %v864_v46 = vadd.f32 %v833_v60, %v821_v25  ;;  %v3798_v3 = vld [vmem:[#allocation7 + $0xc0] sm:$0xff]  }
 0x2bb   :  { %v883_v63 = vpack.c.bf16 %v863_v29, %v861_v59  ;;  %v882_v58 = vpack.c.bf16 %v862_v62, %v860_v6  ;;  %v866_v5 = vadd.f32 %v833_v60, %v823_v9  ;;  %v869_v50 = vadd.f32 %v837_v23, %v826_v53  ;;  %v3056_v12 = vld [vmem:[#allocation7] sm:$0xff]   ;;  %2903 = vmatprep.subr.bf16.mxu1 %v3798_v3  ;;  %v3057_v9 = vld [vmem:[#allocation7 + $0x48] sm:$0xff]  }
 0x2bc   :  { %v885_v51 = vpack.c.bf16 %v867_v49, %v865_v47  ;;  %v871_v0 = vadd.f32 %v837_v23, %v3760_v42  ;;  %v868_v37 = vadd.f32 %v833_v60, %v825_v54  ;;  %v870_v7 = vadd.f32 %v833_v60, %v827_v30  ;;  %v3055_v42 = vld [vmem:[#allocation7 + $0x40] sm:$0xff]   ;;  %v3064_v53 = vld [vmem:[#allocation7 + $0xc8] sm:$0xff]   ;;  %v3059_v23 = vld [vmem:[#allocation7 + $0x50] sm:$0xff]  }
 0x2bd   :  { %v884_v45 = vpack.c.bf16 %v866_v5, %v864_v46  ;;  %v3062_v25 = vld [vmem:[#allocation7 + $0x80] sm:$0xff]   ;;  %2755 = vmatprep.subr.bf16.mxu0 %v3055_v42  ;;  %v3058_v54 = vld [vmem:[#allocation7 + $0x8] sm:$0xff]   ;;  %v3802_v60 = vsub.s32 2, %v3552_v22  ;;  %v3805_v19 = vsub.s32 3, %v3552_v22 }
 0x2be   :  { %1342 = vmatmul.mubr.bf16.gmra.mrb[20].mxu0 %v874_v56  ;;  %1455 = vmatmul.mubr.bf16.gmra.mrb[36].mxu1 %v874_v56  ;;  %v887_v18 = vpack.c.bf16 %v871_v0, %v869_v50  ;;  %v886_v35 = vpack.c.bf16 %v870_v7, %v868_v37  ;;  %v3066_v30 = vld [vmem:[#allocation7 + $0x88] sm:$0xff]  }
 0x2bf   :  { %1351 = vmatprep.mubr.bf16.mxu0 %v877_v41  ;;  %1464 = vmatprep.mubr.bf16.mxu1 %v877_v41  ;;  %v953_v11 = vld [vmem:[#allocation2 + $0x6] ss:$8 sm:$0xf] }
 0x2c0   :  { %2756 = vmatpush3.bf16.msra.mxu0 %v3056_v12  ;;  %2911 = vmatpush3.bf16.msra.mxu1 %v3062_v25  ;;  %v3808_v17 = vrot.slane %v953_v11, %v3555_v26  ;;  %v3811_v14 = vrot.slane %v953_v11, %v3802_v60  ;;  %v3814_v13 = vrot.slane %v953_v11, %v3558_v28  ;;  %v3067_v41 = vld [vmem:[#allocation7 + $0x60] sm:$0xff]   ;;  %v3079_v5 = vld [vmem:[#allocation7 + $0xe8] sm:$0xff]  }
 0x2c1   :  { %2757 = vmatprep.subr.bf16.mxu0 %v3057_v9  ;;  %2904 = vmatprep.subr.bf16.mxu1 %v3064_v53  ;;  %v3817_v22 = vrot.slane %v953_v11, %v3805_v19  ;;  %v3073_v7 = vld [vmem:[#allocation7 + $0x28] sm:$0xff]  }
 0x2c4   :  { %2758 = vmatpush3.bf16.msra.mxu0 %v3058_v54  ;;  %2912 = vmatpush3.bf16.msra.mxu1 %v3066_v30 }
 0x2c5   :  { %2759 = vmatprep.subr.bf16.mxu0 %v3059_v23  ;;  %2905 = vmatprep.subr.bf16.mxu1 %v3068_v34 }
 0x2c6   :  { %1352 = vmatmul.mubr.bf16.gmra.mrb[24].mxu0 %v876_v20  ;;  %1465 = vmatmul.mubr.bf16.gmra.mrb[40].mxu1 %v876_v20 }
 0x2c7   :  { %1361 = vmatprep.mubr.bf16.mxu0 %v879_v33  ;;  %1474 = vmatprep.mubr.bf16.mxu1 %v879_v33  ;;  %v3069_v33 = vld [vmem:[#allocation7 + $0x20] sm:$0xff]  }
 0x2c8   :  { %2760 = vmatpush3.bf16.msra.mxu0 %v3061_v31  ;;  %2913 = vmatpush3.bf16.msra.mxu1 %v3070_v55 }
 0x2c9   :  { %2761 = vmatprep.subr.bf16.mxu0 %v3063_v15  ;;  %2906 = vmatprep.subr.bf16.mxu1 %v3072_v38 }
 0x2cc   :  { %2762 = vmatpush3.bf16.msra.mxu0 %v3065_v8  ;;  %2914 = vmatpush3.bf16.msra.mxu1 %v3074_v4  ;;  %v3075_v8 = vld [vmem:[#allocation7 + $0x70] sm:$0xff]  }
 0x2cd   :  { %2763 = vmatprep.subr.bf16.mxu0 %v3067_v41  ;;  %2907 = vmatprep.subr.bf16.mxu1 %v3076_v1  ;;  %v3083_v4 = vld [vmem:[#allocation7 + $0xf0] sm:$0xff]  }
 0x2ce   :  { %1362 = vmatmul.mubr.bf16.gmra.mrb[28].mxu0 %v878_v44  ;;  %1475 = vmatmul.mubr.bf16.gmra.mrb[44].mxu1 %v878_v44  ;;  %v3077_v41 = vld [vmem:[#allocation7 + $0x30] sm:$0xff]  }
 0x2cf   :  { %1371 = vmatprep.mubr.bf16.mxu0 %v881_v27  ;;  %1484 = vmatprep.mubr.bf16.mxu1 %v881_v27  ;;  %v3084_v1 = vld [vmem:[#allocation7 + $0xb0] sm:$0xff]  }
 0x2d0   :  { %2764 = vmatpush3.bf16.msra.mxu0 %v3069_v33  ;;  %2915 = vmatpush3.bf16.msra.mxu1 %v3078_v36 }
 0x2d1   :  { %2908 = vmatprep.subr.bf16.mxu1 %v3079_v5 }
 0x2d6   :  { %1372 = vmatmul.mubr.bf16.gmra.mrb[32].mxu0 %v880_v57  ;;  %1485 = vmatmul.mubr.bf16.gmra.mrb[48].mxu1 %v880_v57 }
 0x2d7   :  { %1381 = vmatprep.mubr.bf16.mxu0 %v883_v63  ;;  %1494 = vmatprep.mubr.bf16.mxu1 %v883_v63 }
 0x2de   :  { %1382 = vmatmul.mubr.bf16.gmra.mrb[36].mxu0 %v882_v58  ;;  %1495 = vmatmul.mubr.bf16.gmra.mrb[52].mxu1 %v882_v58  ;;  %v3071_v58 = vld [vmem:[#allocation7 + $0x68] sm:$0xff]  }
 0x2df   :  { %1391 = vmatprep.mubr.bf16.mxu0 %v885_v51  ;;  %1504 = vmatprep.mubr.bf16.mxu1 %v885_v51 }
 0x2e0   :  { %2765 = vmatprep.subr.bf16.mxu0 %v3071_v58 }
 0x2e1   :  { %2766 = vmatpush3.bf16.msra.mxu0 %v3073_v7 }
 0x2e2   :  { %2767 = vmatprep.subr.bf16.mxu0 %v3075_v8 }
 0x2e5   :  { %2768 = vmatpush3.bf16.msra.mxu0 %v3077_v41 }
 0x2e6   :  { %1392 = vmatmul.mubr.bf16.gmra.mrb[40].mxu0 %v884_v45  ;;  %1505 = vmatmul.mubr.bf16.gmra.mrb[56].mxu1 %v884_v45  ;;  %v3080_v45 = vld [vmem:[#allocation7 + $0xa8] sm:$0xff]  }
 0x2e7   :  { %1401 = vmatprep.mubr.bf16.mxu0 %v887_v18  ;;  %1514 = vmatprep.mubr.bf16.mxu1 %v887_v18 }
 0x2e8   :  { %2916 = vmatpush3.bf16.msra.mxu1 %v3080_v45 }
 0x2e9   :  { %2909 = vmatprep.subr.bf16.mxu1 %v3083_v4 }
 0x2ec   :  { %2917 = vmatpush3.bf16.msra.mxu1 %v3084_v1 }
 0x2ee   :  { %1402 = vmatmul.mubr.bf16.gmra.mrb[44].mxu0 %v886_v35  ;;  %1515 = vmatmul.mubr.bf16.gmra.mrb[60].mxu1 %v886_v35 }
 0x389   :  { %v1333_v39 = vpop.f32.mrb[16].mxu0  ;;  %v1446_v16 = vpop.f32.mrb[32].mxu1 }
 0x38a   :  { %v1334_v61 = vadd.f32 %v1333_v39, %v3808_v17  ;;  %v1447_v56 = vadd.f32 %v1446_v16, %v3811_v14  ;;  %v1335_v21 = vpop.f32.mrb[17].mxu0  ;;  %v1448_v2 = vpop.f32.mrb[33].mxu1 }
 0x38b   :  { %v1336_v43 = vadd.f32 %v1335_v21, %v3814_v13  ;;  %v1449_v20 = vadd.f32 %v1448_v2, %v3817_v22  ;;  %v1337_v24 = vpop.f32.mrb[18].mxu0  ;;  %v1450_v32 = vpop.f32.mrb[34].mxu1 }
 0x38c   :  { %v3823_v40 = vmax.f32 %v1334_v61, 0.0  ;;  %v3825_v44 = vmax.f32 %v1447_v56, 0.0  ;;  %v1338_v48 = vadd.f32 %v1337_v24, %v3808_v17  ;;  %v1451_v52 = vadd.f32 %v1450_v32, %v3811_v14  ;;  %v1339_v59 = vpop.f32.mrb[19].mxu0  ;;  %v1452_v27 = vpop.f32.mrb[35].mxu1 }
 0x38d   :  { %v3829_v29 = vmax.f32 %v1336_v43, 0.0  ;;  %v3831_v6 = vmax.f32 %v1449_v20, 0.0  ;;  %v1340_v62 = vadd.f32 %v1339_v59, %v3814_v13  ;;  %v1453_v57 = vadd.f32 %v1452_v27, %v3817_v22 }
 0x38e   :  { %4539 = vst [vmem:[#allocation12_spill] sm:$0xff] %v3825_v44  ;;  %v1673_v47 = vmul.f32 %v3823_v40, %v3823_v40  ;;  %v1675_v49 = vmul.f32 %v3825_v44, %v3825_v44  ;;  %v3839_v46 = vmax.f32 %v1338_v48, 0.0  ;;  %v3841_v63 = vmax.f32 %v1451_v52, 0.0  ;;  %v3081_v48 = vld [vmem:[#allocation7 + $0x78] sm:$0xff]  }
 0x38f   :  { %4540 = vst [vmem:[#allocation13_spill] sm:$0xff] %v3831_v6  ;;  %v1674_v50 = vmul.f32 %v3829_v29, %v3829_v29  ;;  %v1676_v51 = vmul.f32 %v3831_v6, %v3831_v6  ;;  %v3847_v0 = vmax.f32 %v1340_v62, 0.0  ;;  %v3849_v37 = vmax.f32 %v1453_v57, 0.0  ;;  %v3082_v57 = vld [vmem:[#allocation7 + $0x38] sm:$0xff]   ;;  %2769 = vmatprep.subr.bf16.mxu0 %v3081_v48 }
 0x390   :  { %4541 = vst [vmem:[#allocation14_spill] sm:$0xff] %v3841_v63  ;;  %v1589_v18 = vadd.f32 %v3839_v46, %v3823_v40  ;;  %v1677_v35 = vmul.f32 %v3839_v46, %v3839_v46  ;;  %v1631_v42 = vadd.f32 %v3841_v63, %v3825_v44  ;;  %v1679_v12 = vmul.f32 %v3841_v63, %v3841_v63 }
 0x391   :  { %4542 = vst [vmem:[#allocation15_spill] sm:$0xff] %v3849_v37  ;;  %v1610_v25 = vadd.f32 %v3847_v0, %v3829_v29  ;;  %v1678_v9 = vmul.f32 %v3847_v0, %v3847_v0  ;;  %v1652_v53 = vadd.f32 %v3849_v37, %v3831_v6  ;;  %v1680_v54 = vmul.f32 %v3849_v37, %v3849_v37  ;;  %v1343_v30 = vpop.f32.mrb[20].mxu0  ;;  %v1456_v23 = vpop.f32.mrb[36].mxu1 }
 0x392   :  { %v1737_v34 = vadd.f32 %v1677_v35, %v1673_v47  ;;  %v1779_v11 = vadd.f32 %v1679_v12, %v1675_v49  ;;  %v1344_v31 = vadd.f32 %v1343_v30, %v3808_v17  ;;  %v1457_v55 = vadd.f32 %v1456_v23, %v3811_v14  ;;  %v1345_v15 = vpop.f32.mrb[21].mxu0  ;;  %v1458_v38 = vpop.f32.mrb[37].mxu1  ;;  %v3085_v47 = vld [vmem:[#allocation7 + $0xf8] sm:$0xff]   ;;  %2770 = vmatpush3.bf16.msra.mxu0 %v3082_v57 }
 0x393   :  { %v1758_v39 = vadd.f32 %v1678_v9, %v1674_v50  ;;  %v1800_v16 = vadd.f32 %v1680_v54, %v1676_v51  ;;  %v1346_v61 = vadd.f32 %v1345_v15, %v3814_v13  ;;  %v1459_v56 = vadd.f32 %v1458_v38, %v3817_v22  ;;  %v1347_v21 = vpop.f32.mrb[22].mxu0  ;;  %v1460_v2 = vpop.f32.mrb[38].mxu1  ;;  %2910 = vmatprep.subr.bf16.mxu1 %v3085_v47 }
 0x394   :  { %v3871_v43 = vmax.f32 %v1344_v31, 0.0  ;;  %v3873_v20 = vmax.f32 %v1457_v55, 0.0  ;;  %v1348_v24 = vadd.f32 %v1347_v21, %v3808_v17  ;;  %v1461_v32 = vadd.f32 %v1460_v2, %v3811_v14  ;;  %v1349_v33 = vpop.f32.mrb[23].mxu0  ;;  %v1462_v36 = vpop.f32.mrb[39].mxu1  ;;  %2819 = vmatprep.subr.bf16.mxu0 %v3798_v3 }
 0x395   :  { %v3877_v52 = vmax.f32 %v1346_v61, 0.0  ;;  %v3879_v59 = vmax.f32 %v1459_v56, 0.0  ;;  %v1350_v27 = vadd.f32 %v1349_v33, %v3814_v13  ;;  %v1463_v62 = vadd.f32 %v1462_v36, %v3817_v22 }
 0x396   :  { %v1590_v49 = vadd.f32 %v1589_v18, %v3871_v43  ;;  %v1681_v58 = vmul.f32 %v3871_v43, %v3871_v43  ;;  %v1632_v5 = vadd.f32 %v1631_v42, %v3873_v20  ;;  %v1683_v50 = vmul.f32 %v3873_v20, %v3873_v20  ;;  %v3086_v18 = vld [vmem:[#allocation7 + $0xb8] sm:$0xff]  }
 0x397   :  { %v1611_v51 = vadd.f32 %v1610_v25, %v3877_v52  ;;  %v1682_v7 = vmul.f32 %v3877_v52, %v3877_v52  ;;  %v1653_v45 = vadd.f32 %v1652_v53, %v3879_v59  ;;  %v1684_v35 = vmul.f32 %v3879_v59, %v3879_v59  ;;  %2918 = vmatpush3.bf16.msra.mxu1 %v3086_v18 }
 0x398   :  { %v1738_v12 = vadd.f32 %v1737_v34, %v1681_v58  ;;  %v1780_v9 = vadd.f32 %v1779_v11, %v1683_v50  ;;  %v3895_v54 = vmax.f32 %v1348_v24, 0.0  ;;  %v3897_v42 = vmax.f32 %v1461_v32, 0.0 }
 0x399   :  { %v1759_v30 = vadd.f32 %v1758_v39, %v1682_v7  ;;  %v1801_v23 = vadd.f32 %v1800_v16, %v1684_v35  ;;  %v3899_v25 = vmax.f32 %v1350_v27, 0.0  ;;  %v3901_v31 = vmax.f32 %v1463_v62, 0.0  ;;  %v1353_v55 = vpop.f32.mrb[24].mxu0  ;;  %v1466_v53 = vpop.f32.mrb[40].mxu1 }
 0x39a   :  { %v1591_v15 = vadd.f32 %v1590_v49, %v3895_v54  ;;  %v1685_v34 = vmul.f32 %v3895_v54, %v3895_v54  ;;  %v1633_v11 = vadd.f32 %v1632_v5, %v3897_v42  ;;  %v1687_v38 = vmul.f32 %v3897_v42, %v3897_v42  ;;  %v1355_v8 = vpop.f32.mrb[25].mxu0  ;;  %v1468_v4 = vpop.f32.mrb[41].mxu1 }
 0x39b   :  { %v1612_v39 = vadd.f32 %v1611_v51, %v3899_v25  ;;  %v1686_v16 = vmul.f32 %v3899_v25, %v3899_v25  ;;  %v1654_v61 = vadd.f32 %v1653_v45, %v3901_v31  ;;  %v1688_v56 = vmul.f32 %v3901_v31, %v3901_v31  ;;  %v1357_v21 = vpop.f32.mrb[26].mxu0  ;;  %v1470_v2 = vpop.f32.mrb[42].mxu1 }
 0x39c   :  { %v1739_v41 = vadd.f32 %v1738_v12, %v1685_v34  ;;  %v1781_v1 = vadd.f32 %v1780_v9, %v1687_v38  ;;  %v1354_v24 = vadd.f32 %v1353_v55, %v3808_v17  ;;  %v1467_v32 = vadd.f32 %v1466_v53, %v3811_v14  ;;  %v1359_v3 = vpop.f32.mrb[27].mxu0  ;;  %v1472_v33 = vpop.f32.mrb[43].mxu1 }
 0x39d   :  { %v1760_v36 = vadd.f32 %v1759_v30, %v1686_v16  ;;  %v1802_v48 = vadd.f32 %v1801_v23, %v1688_v56  ;;  %v1356_v27 = vadd.f32 %v1355_v8, %v3814_v13  ;;  %v1469_v62 = vadd.f32 %v1468_v4, %v3817_v22 }
 0x39e   :  { %v3920_v57 = vmax.f32 %v1354_v24, 0.0  ;;  %v3922_v47 = vmax.f32 %v1467_v32, 0.0  ;;  %v1358_v49 = vadd.f32 %v1357_v21, %v3808_v17  ;;  %v1471_v58 = vadd.f32 %v1470_v2, %v3811_v14 }
 0x39f   :  { %v3926_v5 = vmax.f32 %v1356_v27, 0.0  ;;  %v3928_v50 = vmax.f32 %v1469_v62, 0.0  ;;  %v1360_v51 = vadd.f32 %v1359_v3, %v3814_v13  ;;  %v1473_v7 = vadd.f32 %v1472_v33, %v3817_v22 }
 0x3a0   :  { %4543 = vst [vmem:[#allocation16_spill] sm:$0xff] %v3920_v57  ;;  %v1592_v45 = vadd.f32 %v1591_v15, %v3920_v57  ;;  %v1689_v35 = vmul.f32 %v3920_v57, %v3920_v57  ;;  %v1634_v18 = vadd.f32 %v1633_v11, %v3922_v47  ;;  %v1691_v12 = vmul.f32 %v3922_v47, %v3922_v47 }
 0x3a1   :  { %4544 = vst [vmem:[#allocation17_spill] sm:$0xff] %v3926_v5  ;;  %v1613_v9 = vadd.f32 %v1612_v39, %v3926_v5  ;;  %v1690_v30 = vmul.f32 %v3926_v5, %v3926_v5  ;;  %v1655_v23 = vadd.f32 %v1654_v61, %v3928_v50  ;;  %v1692_v55 = vmul.f32 %v3928_v50, %v3928_v50  ;;  %v1363_v53 = vpop.f32.mrb[28].mxu0  ;;  %v1476_v15 = vpop.f32.mrb[44].mxu1 }
 0x3a2   :  { %v1740_v34 = vadd.f32 %v1739_v41, %v1689_v35  ;;  %v1782_v38 = vadd.f32 %v1781_v1, %v1691_v12  ;;  %v3944_v8 = vmax.f32 %v1358_v49, 0.0  ;;  %v3946_v11 = vmax.f32 %v1471_v58, 0.0  ;;  %v1365_v4 = vpop.f32.mrb[29].mxu0  ;;  %v1478_v16 = vpop.f32.mrb[45].mxu1 }
 0x3a3   :  { %v1761_v56 = vadd.f32 %v1760_v36, %v1690_v30  ;;  %v1803_v39 = vadd.f32 %v1802_v48, %v1692_v55  ;;  %v3948_v21 = vmax.f32 %v1360_v51, 0.0  ;;  %v3950_v2 = vmax.f32 %v1473_v7, 0.0  ;;  %v1367_v61 = vpop.f32.mrb[30].mxu0  ;;  %v1480_v24 = vpop.f32.mrb[46].mxu1 }
 0x3a4   :  { %4545 = vst [vmem:[#allocation18_spill] sm:$0xff] %v3944_v8  ;;  %v1593_v32 = vadd.f32 %v1592_v45, %v3944_v8  ;;  %v1693_v41 = vmul.f32 %v3944_v8, %v3944_v8  ;;  %v1635_v1 = vadd.f32 %v1634_v18, %v3946_v11  ;;  %v1695_v3 = vmul.f32 %v3946_v11, %v3946_v11  ;;  %v1369_v33 = vpop.f32.mrb[31].mxu0  ;;  %v1482_v27 = vpop.f32.mrb[47].mxu1 }
 0x3a5   :  { %4546 = vst [vmem:[#allocation19_spill] sm:$0xff] %v3948_v21  ;;  %v1614_v36 = vadd.f32 %v1613_v9, %v3948_v21  ;;  %v1694_v48 = vmul.f32 %v3948_v21, %v3948_v21  ;;  %v1656_v62 = vadd.f32 %v1655_v23, %v3950_v2  ;;  %v1696_v49 = vmul.f32 %v3950_v2, %v3950_v2 }
 0x3a6   :  { %v1741_v58 = vadd.f32 %v1740_v34, %v1693_v41  ;;  %v1783_v51 = vadd.f32 %v1782_v38, %v1695_v3  ;;  %v1364_v7 = vadd.f32 %v1363_v53, %v3808_v17  ;;  %v1477_v45 = vadd.f32 %v1476_v15, %v3811_v14 }
 0x3a7   :  { %v1762_v35 = vadd.f32 %v1761_v56, %v1694_v48  ;;  %v1804_v18 = vadd.f32 %v1803_v39, %v1696_v49  ;;  %v1366_v12 = vadd.f32 %v1365_v4, %v3814_v13  ;;  %v1479_v9 = vadd.f32 %v1478_v16, %v3817_v22 }
 0x3a8   :  { %v3968_v30 = vmax.f32 %v1364_v7, 0.0  ;;  %v3970_v55 = vmax.f32 %v1477_v45, 0.0  ;;  %v1368_v23 = vadd.f32 %v1367_v61, %v3808_v17  ;;  %v1481_v63 = vadd.f32 %v1480_v24, %v3811_v14 }
 0x3a9   :  { %v3974_v34 = vmax.f32 %v1366_v12, 0.0  ;;  %v3976_v38 = vmax.f32 %v1479_v9, 0.0  ;;  %v1370_v53 = vadd.f32 %v1369_v33, %v3814_v13  ;;  %v1483_v15 = vadd.f32 %v1482_v27, %v3817_v22  ;;  %v1373_v56 = vpop.f32.mrb[32].mxu0  ;;  %v1486_v4 = vpop.f32.mrb[48].mxu1 }
 0x3aa   :  { %4547 = vst [vmem:[#allocation20_spill] sm:$0xff] %v3968_v30  ;;  %4548 = vst [vmem:[#allocation21_spill] sm:$0xff] %v3970_v55  ;;  %v1594_v16 = vadd.f32 %v1593_v32, %v3968_v30  ;;  %v1697_v39 = vmul.f32 %v3968_v30, %v3968_v30  ;;  %v1636_v41 = vadd.f32 %v1635_v1, %v3970_v55  ;;  %v1375_v24 = vpop.f32.mrb[33].mxu0  ;;  %v1488_v3 = vpop.f32.mrb[49].mxu1  ;;  %v3992_v1 = vmax.f32 %v1368_v23, 0.0 }
 0x3ab   :  { %4549 = vst [vmem:[#allocation22_spill] sm:$0xff] %v3974_v34  ;;  %4550 = vst [vmem:[#allocation23_spill] sm:$0xff] %v3976_v38  ;;  %v1699_v61 = vmul.f32 %v3970_v55, %v3970_v55  ;;  %v1615_v48 = vadd.f32 %v1614_v36, %v3974_v34  ;;  %v1698_v33 = vmul.f32 %v3974_v34, %v3974_v34  ;;  %v1377_v49 = vpop.f32.mrb[34].mxu0  ;;  %v1490_v7 = vpop.f32.mrb[50].mxu1  ;;  %v3994_v9 = vmax.f32 %v1481_v63, 0.0 }
 0x3ac   :  { %v1657_v27 = vadd.f32 %v1656_v62, %v3976_v38  ;;  %v1700_v32 = vmul.f32 %v3976_v38, %v3976_v38  ;;  %v1742_v45 = vadd.f32 %v1741_v58, %v1697_v39  ;;  %4551 = vst [vmem:[#allocation24_spill] sm:$0xff] %v3992_v1  ;;  %v1379_v44 = vpop.f32.mrb[35].mxu0  ;;  %v1492_v37 = vpop.f32.mrb[51].mxu1  ;;  %v3996_v30 = vmax.f32 %v1370_v53, 0.0 }
 0x3ad   :  { %v1784_v12 = vadd.f32 %v1783_v51, %v1699_v61  ;;  %4552 = vst [vmem:[#allocation25_spill] sm:$0xff] %v3994_v9  ;;  %v1763_v6 = vadd.f32 %v1762_v35, %v1698_v33  ;;  %v3998_v34 = vmax.f32 %v1483_v15, 0.0  ;;  %v1595_v62 = vadd.f32 %v1594_v16, %v3992_v1 }
 0x3ae   :  { %v1805_v36 = vadd.f32 %v1804_v18, %v1700_v32  ;;  %4553 = vst [vmem:[#allocation26_spill] sm:$0xff] %v3996_v30  ;;  %v1701_v55 = vmul.f32 %v3992_v1, %v3992_v1  ;;  %v1637_v58 = vadd.f32 %v1636_v41, %v3994_v9  ;;  %v1703_v51 = vmul.f32 %v3994_v9, %v3994_v9 }
 0x3af   :  { %4554 = vst [vmem:[#allocation27_spill] sm:$0xff] %v3998_v34  ;;  %v1616_v63 = vadd.f32 %v1615_v48, %v3996_v30  ;;  %v1702_v35 = vmul.f32 %v3996_v30, %v3996_v30  ;;  %v1658_v18 = vadd.f32 %v1657_v27, %v3998_v34  ;;  %v1704_v23 = vmul.f32 %v3998_v34, %v3998_v34 }
 0x3b0   :  { %v1743_v53 = vadd.f32 %v1742_v45, %v1701_v55  ;;  %v1785_v15 = vadd.f32 %v1784_v12, %v1703_v51  ;;  %v1374_v16 = vadd.f32 %v1373_v56, %v3808_v17  ;;  %v1487_v39 = vadd.f32 %v1486_v4, %v3811_v14 }
 0x3b1   :  { %v1764_v41 = vadd.f32 %v1763_v6, %v1702_v35  ;;  %v1806_v61 = vadd.f32 %v1805_v36, %v1704_v23  ;;  %v1376_v33 = vadd.f32 %v1375_v24, %v3814_v13  ;;  %v1489_v48 = vadd.f32 %v1488_v3, %v3817_v22  ;;  %v1383_v32 = vpop.f32.mrb[36].mxu0  ;;  %v1496_v1 = vpop.f32.mrb[52].mxu1 }
 0x3b2   :  { %v4016_v30 = vmax.f32 %v1374_v16, 0.0  ;;  %v4018_v27 = vmax.f32 %v1487_v39, 0.0  ;;  %v1378_v9 = vadd.f32 %v1377_v49, %v3808_v17  ;;  %v1491_v55 = vadd.f32 %v1490_v7, %v3811_v14  ;;  %v1385_v45 = vpop.f32.mrb[37].mxu0  ;;  %v1498_v56 = vpop.f32.mrb[53].mxu1 }
 0x3b3   :  { %v4022_v12 = vmax.f32 %v1376_v33, 0.0  ;;  %v4024_v6 = vmax.f32 %v1489_v48, 0.0  ;;  %v1380_v4 = vadd.f32 %v1379_v44, %v3814_v13  ;;  %v1493_v24 = vadd.f32 %v1492_v37, %v3817_v22  ;;  %v1387_v3 = vpop.f32.mrb[38].mxu0  ;;  %v1500_v36 = vpop.f32.mrb[54].mxu1 }
 0x3b4   :  { %4555 = vst [vmem:[#allocation28_spill] sm:$0xff] %v4016_v30  ;;  %4556 = vst [vmem:[#allocation29_spill] sm:$0xff] %v4018_v27  ;;  %v1596_v51 = vadd.f32 %v1595_v62, %v4016_v30  ;;  %v1705_v35 = vmul.f32 %v4016_v30, %v4016_v30  ;;  %v1638_v49 = vadd.f32 %v1637_v58, %v4018_v27  ;;  %v1389_v23 = vpop.f32.mrb[39].mxu0  ;;  %v1502_v16 = vpop.f32.mrb[55].mxu1  ;;  %v4040_v30 = vmax.f32 %v1378_v9, 0.0 }
 0x3b5   :  { %4557 = vst [vmem:[#allocation30_spill] sm:$0xff] %v4022_v12  ;;  %4558 = vst [vmem:[#allocation31_spill] sm:$0xff] %v4024_v6  ;;  %v1707_v7 = vmul.f32 %v4018_v27, %v4018_v27  ;;  %v1617_v39 = vadd.f32 %v1616_v63, %v4022_v12  ;;  %v1706_v44 = vmul.f32 %v4022_v12, %v4022_v12  ;;  %v4042_v58 = vmax.f32 %v1491_v55, 0.0 }
 0x3b6   :  { %v1659_v37 = vadd.f32 %v1658_v18, %v4024_v6  ;;  %v1708_v62 = vmul.f32 %v4024_v6, %v4024_v6  ;;  %v1744_v33 = vadd.f32 %v1743_v53, %v1705_v35  ;;  %4559 = vst [vmem:[#allocation32_spill] sm:$0xff] %v4040_v30  ;;  %v4044_v57 = vmax.f32 %v1380_v4, 0.0 }
 0x3b7   :  { %v1786_v48 = vadd.f32 %v1785_v15, %v1707_v7  ;;  %4560 = vst [vmem:[#allocation33_spill] sm:$0xff] %v4042_v58  ;;  %v1765_v8 = vadd.f32 %v1764_v41, %v1706_v44  ;;  %v4046_v34 = vmax.f32 %v1493_v24, 0.0  ;;  %v1597_v63 = vadd.f32 %v1596_v51, %v4040_v30 }
 0x3b8   :  { %v1807_v27 = vadd.f32 %v1806_v61, %v1708_v62  ;;  %4561 = vst [vmem:[#allocation34_spill] sm:$0xff] %v4044_v57  ;;  %v1709_v18 = vmul.f32 %v4040_v30, %v4040_v30  ;;  %v1639_v12 = vadd.f32 %v1638_v49, %v4042_v58  ;;  %v1711_v53 = vmul.f32 %v4042_v58, %v4042_v58 }
 0x3b9   :  { %4562 = vst [vmem:[#allocation35_spill] sm:$0xff] %v4046_v34  ;;  %v1618_v9 = vadd.f32 %v1617_v39, %v4044_v57  ;;  %v1710_v15 = vmul.f32 %v4044_v57, %v4044_v57  ;;  %v1660_v41 = vadd.f32 %v1659_v37, %v4046_v34  ;;  %v1712_v61 = vmul.f32 %v4046_v34, %v4046_v34  ;;  %v1393_v55 = vpop.f32.mrb[40].mxu0  ;;  %v1506_v4 = vpop.f32.mrb[56].mxu1 }
 0x3ba   :  { %v1745_v24 = vadd.f32 %v1744_v33, %v1709_v18  ;;  %v1787_v51 = vadd.f32 %v1786_v48, %v1711_v53  ;;  %v1384_v35 = vadd.f32 %v1383_v32, %v3808_v17  ;;  %v1497_v49 = vadd.f32 %v1496_v1, %v3811_v14  ;;  %v1395_v7 = vpop.f32.mrb[41].mxu0  ;;  %v1508_v44 = vpop.f32.mrb[57].mxu1 }
 0x3bb   :  { %v1766_v62 = vadd.f32 %v1765_v8, %v1710_v15  ;;  %v1808_v39 = vadd.f32 %v1807_v27, %v1712_v61  ;;  %v1386_v30 = vadd.f32 %v1385_v45, %v3814_v13  ;;  %v1499_v57 = vadd.f32 %v1498_v56, %v3817_v22  ;;  %v1397_v37 = vpop.f32.mrb[42].mxu0  ;;  %v1510_v58 = vpop.f32.mrb[58].mxu1 }
 0x3bc   :  { %v4064_v6 = vmax.f32 %v1384_v35, 0.0  ;;  %v4066_v34 = vmax.f32 %v1497_v49, 0.0  ;;  %v1388_v33 = vadd.f32 %v1387_v3, %v3808_v17  ;;  %v1501_v32 = vadd.f32 %v1500_v36, %v3811_v14  ;;  %v1399_v48 = vpop.f32.mrb[43].mxu0  ;;  %v1512_v1 = vpop.f32.mrb[59].mxu1 }
 0x3bd   :  { %v4070_v18 = vmax.f32 %v1386_v30, 0.0  ;;  %v4072_v8 = vmax.f32 %v1499_v57, 0.0  ;;  %v1390_v27 = vadd.f32 %v1389_v23, %v3814_v13  ;;  %v1503_v45 = vadd.f32 %v1502_v16, %v3817_v22 }
 0x3be   :  { %4563 = vst [vmem:[#allocation36_spill] sm:$0xff] %v4064_v6  ;;  %4564 = vst [vmem:[#allocation37_spill] sm:$0xff] %v4066_v34  ;;  %v1598_v56 = vadd.f32 %v1597_v63, %v4064_v6  ;;  %v1713_v53 = vmul.f32 %v4064_v6, %v4064_v6  ;;  %v1640_v15 = vadd.f32 %v1639_v12, %v4066_v34  ;;  %v4088_v61 = vmax.f32 %v1388_v33, 0.0 }
 0x3bf   :  { %4565 = vst [vmem:[#allocation38_spill] sm:$0xff] %v4070_v18  ;;  %4566 = vst [vmem:[#allocation39_spill] sm:$0xff] %v4072_v8  ;;  %v1715_v3 = vmul.f32 %v4066_v34, %v4066_v34  ;;  %v1619_v36 = vadd.f32 %v1618_v9, %v4070_v18  ;;  %v1714_v57 = vmul.f32 %v4070_v18, %v4070_v18  ;;  %v4090_v35 = vmax.f32 %v1501_v32, 0.0 }
 0x3c0   :  { %v1661_v30 = vadd.f32 %v1660_v41, %v4072_v8  ;;  %v1716_v23 = vmul.f32 %v4072_v8, %v4072_v8  ;;  %v1746_v16 = vadd.f32 %v1745_v24, %v1713_v53  ;;  %4567 = vst [vmem:[#allocation40_spill] sm:$0xff] %v4088_v61  ;;  %v4092_v6 = vmax.f32 %v1390_v27, 0.0 }
 0x3c1   :  { %v1788_v63 = vadd.f32 %v1787_v51, %v1715_v3  ;;  %4568 = vst [vmem:[#allocation41_spill] sm:$0xff] %v4090_v35  ;;  %v1767_v12 = vadd.f32 %v1766_v62, %v1714_v57  ;;  %v4094_v34 = vmax.f32 %v1503_v45, 0.0  ;;  %v1403_v9 = vpop.f32.mrb[44].mxu0  ;;  %v1516_v38 = vpop.f32.mrb[60].mxu1  ;;  %v1599_v18 = vadd.f32 %v1598_v56, %v4088_v61 }
 0x3c2   :  { %v1809_v49 = vadd.f32 %v1808_v39, %v1716_v23  ;;  %4569 = vst [vmem:[#allocation42_spill] sm:$0xff] %v4092_v6  ;;  %v1717_v41 = vmul.f32 %v4088_v61, %v4088_v61  ;;  %v1641_v24 = vadd.f32 %v1640_v15, %v4090_v35  ;;  %v1719_v51 = vmul.f32 %v4090_v35, %v4090_v35  ;;  %v1405_v33 = vpop.f32.mrb[45].mxu0  ;;  %v1518_v32 = vpop.f32.mrb[61].mxu1 }
 0x3c3   :  { %4570 = vst [vmem:[#allocation43_spill] sm:$0xff] %v4094_v34  ;;  %v1620_v62 = vadd.f32 %v1619_v36, %v4092_v6  ;;  %v1718_v39 = vmul.f32 %v4092_v6, %v4092_v6  ;;  %v1662_v27 = vadd.f32 %v1661_v30, %v4094_v34  ;;  %v1720_v45 = vmul.f32 %v4094_v34, %v4094_v34  ;;  %v1407_v56 = vpop.f32.mrb[46].mxu0  ;;  %v1520_v53 = vpop.f32.mrb[62].mxu1 }
 0x3c4   :  { %v1747_v3 = vadd.f32 %v1746_v16, %v1717_v41  ;;  %v1789_v57 = vadd.f32 %v1788_v63, %v1719_v51  ;;  %v1394_v15 = vadd.f32 %v1393_v55, %v3808_v17  ;;  %v1507_v23 = vadd.f32 %v1506_v4, %v3811_v14  ;;  %v1409_v61 = vpop.f32.mrb[47].mxu0  ;;  %v1522_v35 = vpop.f32.mrb[63].mxu1 }
 0x3c5   :  { %v1768_v8 = vadd.f32 %v1767_v12, %v1718_v39  ;;  %v1810_v36 = vadd.f32 %v1809_v49, %v1720_v45  ;;  %v1396_v21 = vadd.f32 %v1395_v7, %v3814_v13  ;;  %v1509_v6 = vadd.f32 %v1508_v44, %v3817_v22 }
 0x3c6   :  { %v4112_v30 = vmax.f32 %v1394_v15, 0.0  ;;  %v4114_v5 = vmax.f32 %v1507_v23, 0.0  ;;  %v1398_v34 = vadd.f32 %v1397_v37, %v3808_v17  ;;  %v1511_v16 = vadd.f32 %v1510_v58, %v3811_v14 }
 0x3c7   :  { %v4118_v63 = vmax.f32 %v1396_v21, 0.0  ;;  %v4120_v55 = vmax.f32 %v1509_v6, 0.0  ;;  %v1400_v4 = vadd.f32 %v1399_v48, %v3814_v13  ;;  %v1513_v12 = vadd.f32 %v1512_v1, %v3817_v22 }
 0x3c8   :  { %4571 = vst [vmem:[#allocation44_spill] sm:$0xff] %v4112_v30  ;;  %v1600_v7 = vadd.f32 %v1599_v18, %v4112_v30  ;;  %v1721_v44 = vmul.f32 %v4112_v30, %v4112_v30  ;;  %v1642_v49 = vadd.f32 %v1641_v24, %v4114_v5  ;;  %v1723_v37 = vmul.f32 %v4114_v5, %v4114_v5 }
 0x3c9   :  { %v1621_v58 = vadd.f32 %v1620_v62, %v4118_v63  ;;  %v1722_v21 = vmul.f32 %v4118_v63, %v4118_v63  ;;  %v1663_v6 = vadd.f32 %v1662_v27, %v4120_v55  ;;  %v1724_v48 = vmul.f32 %v4120_v55, %v4120_v55 }
 0x3ca   :  { %v1748_v1 = vadd.f32 %v1747_v3, %v1721_v44  ;;  %v1790_v18 = vadd.f32 %v1789_v57, %v1723_v37  ;;  %v4136_v41 = vmax.f32 %v1398_v34, 0.0  ;;  %v4138_v51 = vmax.f32 %v1511_v16, 0.0 }
 0x3cb   :  { %v1769_v24 = vadd.f32 %v1768_v8, %v1722_v21  ;;  %v1811_v39 = vadd.f32 %v1810_v36, %v1724_v48  ;;  %v4140_v45 = vmax.f32 %v1400_v4, 0.0  ;;  %v4142_v15 = vmax.f32 %v1513_v12, 0.0 }
 0x3cc   :  { %4572 = vst [vmem:[#allocation45_spill] sm:$0xff] %v4136_v41  ;;  %v1601_v62 = vadd.f32 %v1600_v7, %v4136_v41  ;;  %v1725_v27 = vmul.f32 %v4136_v41, %v4136_v41  ;;  %v1643_v23 = vadd.f32 %v1642_v49, %v4138_v51  ;;  %v1727_v3 = vmul.f32 %v4138_v51, %v4138_v51 }
 0x3cd   :  { %v1622_v34 = vadd.f32 %v1621_v58, %v4140_v45  ;;  %v1726_v8 = vmul.f32 %v4140_v45, %v4140_v45  ;;  %v1664_v57 = vadd.f32 %v1663_v6, %v4142_v15  ;;  %v1728_v36 = vmul.f32 %v4142_v15, %v4142_v15 }
 0x3ce   :  { %v1749_v16 = vadd.f32 %v1748_v1, %v1725_v27  ;;  %v1791_v4 = vadd.f32 %v1790_v18, %v1727_v3  ;;  %v1404_v12 = vadd.f32 %v1403_v9, %v3808_v17  ;;  %v1517_v7 = vadd.f32 %v1516_v38, %v3811_v14 }
 0x3cf   :  { %v1770_v44 = vadd.f32 %v1769_v24, %v1726_v8  ;;  %v1812_v49 = vadd.f32 %v1811_v39, %v1728_v36  ;;  %v1406_v37 = vadd.f32 %v1405_v33, %v3814_v13  ;;  %v1519_v58 = vadd.f32 %v1518_v32, %v3817_v22 }
 0x3d0   :  { %v4160_v21 = vmax.f32 %v1404_v12, 0.0  ;;  %v4162_v48 = vmax.f32 %v1517_v7, 0.0  ;;  %v1408_v6 = vadd.f32 %v1407_v56, %v3808_v17  ;;  %v1521_v41 = vadd.f32 %v1520_v53, %v3811_v14 }
 0x3d1   :  { %v4166_v1 = vmax.f32 %v1406_v37, 0.0  ;;  %v4168_v18 = vmax.f32 %v1519_v58, 0.0  ;;  %v1410_v38 = vadd.f32 %v1409_v61, %v3814_v13  ;;  %v1523_v9 = vadd.f32 %v1522_v35, %v3817_v22 }
 0x3d2   :  { %4573 = vst [vmem:[#allocation46_spill] sm:$0xff] %v4162_v48  ;;  %v1602_v33 = vadd.f32 %v1601_v62, %v4160_v21  ;;  %v1729_v32 = vmul.f32 %v4160_v21, %v4160_v21  ;;  %v1644_v24 = vadd.f32 %v1643_v23, %v4162_v48  ;;  %v1731_v17 = vmul.f32 %v4162_v48, %v4162_v48 }
 0x3d3   :  { %4574 = vst [vmem:[#allocation47_spill] sm:$0xff] %v4166_v1  ;;  %v1623_v14 = vadd.f32 %v1622_v34, %v4166_v1  ;;  %v1730_v56 = vmul.f32 %v4166_v1, %v4166_v1  ;;  %v1665_v53 = vadd.f32 %v1664_v57, %v4168_v18  ;;  %v1732_v13 = vmul.f32 %v4168_v18, %v4168_v18 }
 0x3d4   :  { %v1750_v22 = vadd.f32 %v1749_v16, %v1729_v32  ;;  %v1792_v61 = vadd.f32 %v1791_v4, %v1731_v17  ;;  %v4184_v35 = vmax.f32 %v1408_v6, 0.0  ;;  %v4186_v39 = vmax.f32 %v1521_v41, 0.0 }
 0x3d5   :  { %v1771_v62 = vadd.f32 %v1770_v44, %v1730_v56  ;;  %v1813_v27 = vadd.f32 %v1812_v49, %v1732_v13  ;;  %v4188_v23 = vmax.f32 %v1410_v38, 0.0  ;;  %v4190_v3 = vmax.f32 %v1523_v9, 0.0 }
 0x3d6   :  { %4575 = vst [vmem:[#allocation48_spill] sm:$0xff] %v4186_v39  ;;  %v1603_v34 = vadd.f32 %v1602_v33, %v4184_v35  ;;  %v1733_v8 = vmul.f32 %v4184_v35, %v4184_v35  ;;  %v1645_v57 = vadd.f32 %v1644_v24, %v4186_v39  ;;  %v1735_v36 = vmul.f32 %v4186_v39, %v4186_v39 }
 0x3d7   :  { %4576 = vst [vmem:[#allocation49_spill] sm:$0xff] %v4188_v23  ;;  %v1624_v16 = vadd.f32 %v1623_v14, %v4188_v23  ;;  %v1734_v41 = vmul.f32 %v4188_v23, %v4188_v23  ;;  %v1666_v4 = vadd.f32 %v1665_v53, %v4190_v3  ;;  %v1736_v12 = vmul.f32 %v4190_v3, %v4190_v3 }
 0x3d8   :  { %v1604_v7 = vrot.slane %v1603_v34, 4  ;;  %v1751_v44 = vadd.f32 %v1750_v22, %v1733_v8  ;;  %v1646_v49 = vrot.slane %v1645_v57, 4  ;;  %v1793_v37 = vadd.f32 %v1792_v61, %v1735_v36 }
 0x3d9   :  { %v1625_v58 = vrot.slane %v1624_v16, 4  ;;  %v1772_v6 = vadd.f32 %v1771_v62, %v1734_v41  ;;  %v1667_v38 = vrot.slane %v1666_v4, 4  ;;  %v1814_v9 = vadd.f32 %v1813_v27, %v1736_v12 }
 0x3da   :  { %v1605_v33 = vadd.f32 %v1604_v7, %v1603_v34  ;;  %v1752_v32 = vrot.slane %v1751_v44, 4  ;;  %v1647_v24 = vadd.f32 %v1646_v49, %v1645_v57  ;;  %v1794_v17 = vrot.slane %v1793_v37, 4 }
 0x3db   :  { %v1626_v14 = vadd.f32 %v1625_v58, %v1624_v16  ;;  %v1773_v56 = vrot.slane %v1772_v6, 4  ;;  %v1668_v13 = vadd.f32 %v1667_v38, %v1666_v4  ;;  %v1815_v23 = vrot.slane %v1814_v9, 4 }
 0x3dc   :  { %v1606_v53 = vrot.slane %v1605_v33, 2  ;;  %v1753_v1 = vadd.f32 %v1752_v32, %v1751_v44  ;;  %v1648_v39 = vrot.slane %v1647_v24, 2  ;;  %v1795_v48 = vadd.f32 %v1794_v17, %v1793_v37 }
 0x3dd   :  { %v1627_v30 = vrot.slane %v1626_v14, 2  ;;  %v1774_v22 = vadd.f32 %v1773_v56, %v1772_v6  ;;  %v1669_v8 = vrot.slane %v1668_v13, 2  ;;  %v1816_v61 = vadd.f32 %v1815_v23, %v1814_v9 }
 0x3de   :  { %v1607_v36 = vadd.f32 %v1606_v53, %v1605_v33  ;;  %v1754_v62 = vrot.slane %v1753_v1, 2  ;;  %v1649_v41 = vadd.f32 %v1648_v39, %v1647_v24  ;;  %v1796_v27 = vrot.slane %v1795_v48, 2 }
 0x3df   :  { %v1628_v34 = vadd.f32 %v1627_v30, %v1626_v14  ;;  %v1775_v12 = vrot.slane %v1774_v22, 2  ;;  %v1670_v57 = vadd.f32 %v1669_v8, %v1668_v13  ;;  %v1817_v7 = vrot.slane %v1816_v61, 2 }
 0x3e0   :  { %v1608_v16 = vrot.slane %v1607_v36, 1  ;;  %v1755_v49 = vadd.f32 %v1754_v62, %v1753_v1  ;;  %v1650_v4 = vrot.slane %v1649_v41, 1  ;;  %v1797_v58 = vadd.f32 %v1796_v27, %v1795_v48 }
 0x3e1   :  { %v1629_v38 = vrot.slane %v1628_v34, 1  ;;  %v1776_v44 = vadd.f32 %v1775_v12, %v1774_v22  ;;  %v1671_v32 = vrot.slane %v1670_v57, 1  ;;  %v1818_v37 = vadd.f32 %v1817_v7, %v1816_v61 }
 0x3e2   :  { %v1609_v17 = vadd.f32 %v1608_v16, %v1607_v36  ;;  %v1756_v6 = vrot.slane %v1755_v49, 1  ;;  %v1651_v56 = vadd.f32 %v1650_v4, %v1649_v41  ;;  %v1798_v23 = vrot.slane %v1797_v58, 1 }
 0x3e3   :  { %v1630_v9 = vadd.f32 %v1629_v38, %v1628_v34  ;;  %v1777_v33 = vrot.slane %v1776_v44, 1  ;;  %v1672_v39 = vadd.f32 %v1671_v32, %v1670_v57  ;;  %v1819_v24 = vrot.slane %v1818_v37, 1 }
 0x3e4   :  { %v1757_v30 = vadd.f32 %v1756_v6, %v1755_v49  ;;  %v1821_v14 = vmul.f32 0.0078125, %v1609_v17  ;;  %v1799_v13 = vadd.f32 %v1798_v23, %v1797_v58  ;;  %v1823_v53 = vmul.f32 0.0078125, %v1651_v56 }
 0x3e5   :  { %v1778_v8 = vadd.f32 %v1777_v33, %v1776_v44  ;;  %v1822_v1 = vmul.f32 0.0078125, %v1630_v9  ;;  %v1820_v62 = vadd.f32 %v1819_v24, %v1818_v37  ;;  %v1824_v48 = vmul.f32 0.0078125, %v1672_v39 }
 0x3e6   :  { %v1825_v27 = vmul.f32 0.0078125, %v1757_v30  ;;  %v1829_v22 = vmul.f32 %v1821_v14, %v1821_v14  ;;  %v1827_v12 = vmul.f32 0.0078125, %v1799_v13  ;;  %v1831_v61 = vmul.f32 %v1823_v53, %v1823_v53 }
 0x3e7   :  { %v1826_v36 = vmul.f32 0.0078125, %v1778_v8  ;;  %v1830_v7 = vmul.f32 %v1822_v1, %v1822_v1  ;;  %v1828_v41 = vmul.f32 0.0078125, %v1820_v62  ;;  %v1832_v16 = vmul.f32 %v1824_v48, %v1824_v48 }
 0x3e8   :  { %v1833_v34 = vsub.f32 %v1825_v27, %v1829_v22  ;;  %v1835_v4 = vsub.f32 %v1827_v12, %v1831_v61  ;;  %v955_v27 = vld [vmem:[#allocation2 + $0x7] ss:$8 sm:$0xf] }
 0x3e9   :  { %v1834_v57 = vsub.f32 %v1826_v36, %v1830_v7  ;;  %v1836_v38 = vsub.f32 %v1828_v41, %v1832_v16 }
 0x3ea   :  { %v1837_v49 = vmax.f32 %v1833_v34, 0.0  ;;  %v1839_v32 = vmax.f32 %v1835_v4, 0.0 }
 0x3eb   :  { %v1838_v58 = vmax.f32 %v1834_v57, 0.0  ;;  %v1840_v17 = vmax.f32 %v1836_v38, 0.0 }
 0x3ec   :  { %v1841_v44 = vadd.f32 1e-05, %v1837_v49  ;;  %v1843_v6 = vadd.f32 1e-05, %v1839_v32 }
 0x3ed   :  { %v1842_v37 = vadd.f32 1e-05, %v1838_v58  ;;  %v1844_v56 = vadd.f32 1e-05, %v1840_v17 }
 0x3ee   :  { %3093 = vrsqrt.f32 %v1841_v44 }
 0x3ef   :  { %3095 = vrsqrt.f32 %v1843_v6  ;;  %v957_v6 = vld [vmem:[#allocation2 + $0x20] ss:$8 sm:$0xf] }
 0x3f0   :  { %3097 = vrsqrt.f32 %v1842_v37 }
 0x3f1   :  { %3099 = vrsqrt.f32 %v1844_v56 }
 0x3f8   :  { %v3094_v23 = vpop.eup %3093 }
 0x3f9   :  { %v3096_v9 = vpop.eup %3095 }
 0x3fa   :  { %v3098_v33 = vpop.eup %3097 }
 0x3fb   :  { %v3100_v39 = vpop.eup %3099  ;;  %v1853_v24 = vcombine.low %v3094_v23, %v3098_v33 }
 0x3fc   :  { %v1854_v30 = vcombine.low %v3096_v9, %v3100_v39 }
 0x3fd   :  { %v1861_v13 = vrot.slane %v1853_v24, %v3754_v10 }
 0x3fe   :  { %v1868_v8 = vrot.slane %v1854_v30, %v3754_v10 }
 0x400   :  { %v1869_v62 = vcombine.low %v1861_v13, %v1868_v8 }
 0x402   :  { %v1876_v22 = vrot.slane %v1869_v62, %v3754_v10 }
 0x404   :  { %v1878_v12 = vmul.f32 %v1876_v22, %v955_v27 }
 0x406   :  { %v4208_v61 = vrot.slane %v1878_v12, %v3555_v26  ;;  %v4211_v36 = vrot.slane %v1878_v12, %v3558_v28  ;;  %v4214_v7 = vrot.slane %v1878_v12, %v3802_v60  ;;  %v4217_v41 = vrot.slane %v1878_v12, %v3805_v19 }
 0x408   :  { %v1900_v16 = vmul.f32 %v4208_v61, %v1821_v14  ;;  %v1901_v34 = vmul.f32 %v4211_v36, %v1822_v1  ;;  %v1902_v4 = vmul.f32 %v4214_v7, %v1823_v53  ;;  %v1903_v57 = vmul.f32 %v4217_v41, %v1824_v48 }
 0x409   :  { %v4225_v38 = vmul.f32 %v4217_v41, %v4190_v3  ;;  %v1935_v1 = vmul.f32 %v4211_v36, %v3829_v29  ;;  %v1939_v53 = vmul.f32 %v4211_v36, %v3847_v0  ;;  %v1945_v3 = vmul.f32 %v4217_v41, %v3879_v59 }
 0x40a   :  { %v1908_v49 = vcombine.low %v1900_v16, %v1901_v34  ;;  %v1909_v32 = vcombine.low %v1902_v4, %v1903_v57  ;;  %v1949_v37 = vmul.f32 %v4217_v41, %v3901_v31  ;;  %v1934_v56 = vmul.f32 %v4208_v61, %v3823_v40  ;;  %v4577_v4 = vld [vmem:[#allocation17_spill] sm:$0xff] }
 0x40b   :  { %v1938_v23 = vmul.f32 %v4208_v61, %v3839_v46  ;;  %v1948_v29 = vmul.f32 %v4214_v7, %v3897_v42  ;;  %v1943_v0 = vmul.f32 %v4211_v36, %v3877_v52  ;;  %v1947_v59 = vmul.f32 %v4211_v36, %v3899_v25 }
 0x40c   :  { %v1916_v58 = vrot.slane %v1908_v49, %v3754_v10  ;;  %v1923_v17 = vrot.slane %v1909_v32, %v3754_v10  ;;  %v1953_v42 = vmul.f32 %v4217_v41, %v3928_v50  ;;  %v1957_v52 = vmul.f32 %v4217_v41, %v3950_v2  ;;  %v4578_v49 = vld [vmem:[#allocation19_spill] sm:$0xff] }
 0x40d   :  { %v1942_v25 = vmul.f32 %v4208_v61, %v3871_v43  ;;  %v1952_v12 = vmul.f32 %v4214_v7, %v3922_v47  ;;  %v1956_v16 = vmul.f32 %v4214_v7, %v3946_v11  ;;  %v1951_v57 = vmul.f32 %v4211_v36, %v4577_v4 }
 0x40e   :  { %v1924_v44 = vcombine.low %v1916_v58, %v1923_v17  ;;  %v1955_v32 = vmul.f32 %v4211_v36, %v4578_v49  ;;  %v3133_v58 = vld [vmem:[#allocation7 + $0x80] sm:$0xff]  }
 0x410   :  { %v1931_v14 = vrot.slane %v1924_v44, %v3754_v10  ;;  %v1944_v10 = vmul.f32 %v4214_v7, %v3873_v20  ;;  %v4579_v44 = vld [vmem:[#allocation23_spill] sm:$0xff] }
 0x411   :  { %v1961_v47 = vmul.f32 %v4217_v41, %v4579_v44  ;;  %v4590_v44 = vld [vmem:[#allocation24_spill] sm:$0xff] }
 0x412   :  { %v1933_v48 = vsub.f32 %v957_v6, %v1931_v14  ;;  %v4580_v6 = vld [vmem:[#allocation27_spill] sm:$0xff]  ;;  %v3134_v14 = vld [vmem:[#allocation7 + $0xc8] sm:$0xff]  }
 0x413   :  { %v1965_v11 = vmul.f32 %v4217_v41, %v4580_v6  ;;  %v4591_v6 = vld [vmem:[#allocation29_spill] sm:$0xff] }
 0x414   :  { %v4251_v31 = vrot.slane %v1933_v48, %v3555_v26  ;;  %v4254_v40 = vrot.slane %v1933_v48, %v3558_v28  ;;  %v4257_v46 = vrot.slane %v1933_v48, %v3802_v60  ;;  %v4260_v20 = vrot.slane %v1933_v48, %v3805_v19 }
 0x415   :  { %v1946_v26 = vmul.f32 %v4208_v61, %v3895_v54 }
 0x416   :  { %v2020_v28 = vadd.f32 %v4254_v40, %v1935_v1  ;;  %v2024_v60 = vadd.f32 %v4254_v40, %v1939_v53  ;;  %v2030_v9 = vadd.f32 %v4260_v20, %v1945_v3  ;;  %v2034_v19 = vadd.f32 %v4260_v20, %v1949_v37 }
 0x417   :  { %v2019_v33 = vadd.f32 %v4251_v31, %v1934_v56  ;;  %v2023_v50 = vadd.f32 %v4251_v31, %v1938_v23  ;;  %v2029_v2 = vadd.f32 %v4257_v46, %v1944_v10  ;;  %v2033_v39 = vadd.f32 %v4257_v46, %v1948_v29  ;;  %v3135_v10 = vld [vmem:[#allocation7 + $0x88] sm:$0xff]  }
 0x418   :  { %v2084_v43 = vpack.c.bf16 %v2024_v60, %v2020_v28  ;;  %v2090_v24 = vpack.c.bf16 %v2034_v19, %v2030_v9  ;;  %v2028_v54 = vadd.f32 %v4254_v40, %v1943_v0  ;;  %v2032_v30 = vadd.f32 %v4254_v40, %v1947_v59  ;;  %v3136_v59 = vld [vmem:[#allocation7 + $0xd0] sm:$0xff]   ;;  %v4583_v9 = vld [vmem:[#allocation21_spill] sm:$0xff] }
 0x419   :  { %v2083_v13 = vpack.c.bf16 %v2023_v50, %v2019_v33  ;;  %v2089_v8 = vpack.c.bf16 %v2033_v39, %v2029_v2  ;;  %v2038_v62 = vadd.f32 %v4260_v20, %v1953_v42  ;;  %v2042_v27 = vadd.f32 %v4260_v20, %v1957_v52  ;;  %v4581_v42 = vld [vmem:[#allocation16_spill] sm:$0xff]  ;;  %v4584_v33 = vld [vmem:[#allocation25_spill] sm:$0xff]  ;;  %v4585_v2 = vld [vmem:[#allocation22_spill] sm:$0xff] }
 0x41a   :  { %2410 = vmatprep.mubr.bf16.mxu0 %v2084_v43  ;;  %2515 = vmatprep.mubr.bf16.mxu1 %v2090_v24  ;;  %v2088_v22 = vpack.c.bf16 %v2032_v30, %v2028_v54  ;;  %v2027_v17 = vadd.f32 %v4251_v31, %v1942_v25  ;;  %v2031_v1 = vadd.f32 %v4251_v31, %v1946_v26  ;;  %v4582_v25 = vld [vmem:[#allocation18_spill] sm:$0xff]  ;;  %v4587_v54 = vld [vmem:[#allocation31_spill] sm:$0xff] }
 0x41b   :  { %2411 = vmatmul.mubr.bf16.vlgmr.msra.gmra.mrb[48].mxu0 %v2083_v13  ;;  %2516 = vmatmul.mubr.bf16.vlgmr.msra.gmra.mrb[64].mxu1 %v2089_v8  ;;  %v2094_v34 = vpack.c.bf16 %v2042_v27, %v2038_v62  ;;  %v2037_v53 = vadd.f32 %v4257_v46, %v1952_v12  ;;  %v2041_v3 = vadd.f32 %v4257_v46, %v1956_v16  ;;  %v4586_v43 = vld [vmem:[#allocation26_spill] sm:$0xff]  ;;  %v4588_v62 = vld [vmem:[#allocation35_spill] sm:$0xff] }
 0x41c   :  { %2820 = vmatpush3.bf16.msra.mxu0 %v3133_v58  ;;  %2418 = vmatprep.mubr.bf16.mxu0 %v2088_v22  ;;  %v2036_v48 = vadd.f32 %v4254_v40, %v1951_v57  ;;  %v2040_v37 = vadd.f32 %v4254_v40, %v1955_v32  ;;  %v2046_v56 = vadd.f32 %v4260_v20, %v1961_v47  ;;  %v3137_v22 = vld [vmem:[#allocation7 + $0x90] sm:$0xff]   ;;  %v3138_v32 = vld [vmem:[#allocation7 + $0xd8] sm:$0xff]   ;;  %v4589_v58 = vld [vmem:[#allocation20_spill] sm:$0xff] }
 0x41d   :  { %2523 = vmatprep.mubr.bf16.mxu1 %v2094_v34  ;;  %2821 = vmatprep.subr.bf16.mxu0 %v3134_v14  ;;  %v2050_v23 = vadd.f32 %v4260_v20, %v1965_v11  ;;  %v2087_v29 = vpack.c.bf16 %v2031_v1, %v2027_v17  ;;  %v2093_v0 = vpack.c.bf16 %v2041_v3, %v2037_v53  ;;  %v4592_v14 = vld [vmem:[#allocation33_spill] sm:$0xff]  ;;  %v4593_v53 = vld [vmem:[#allocation30_spill] sm:$0xff] }
 0x41e   :  { %v1950_v52 = vmul.f32 %v4208_v61, %v4581_v42  ;;  %v1954_v26 = vmul.f32 %v4208_v61, %v4582_v25  ;;  %v2092_v28 = vpack.c.bf16 %v2040_v37, %v2036_v48  ;;  %v1960_v19 = vmul.f32 %v4214_v7, %v4583_v9  ;;  %v4594_v37 = vld [vmem:[#allocation34_spill] sm:$0xff] }
 0x41f   :  { %v2098_v60 = vpack.c.bf16 %v2050_v23, %v2046_v56  ;;  %v1964_v50 = vmul.f32 %v4214_v7, %v4584_v33  ;;  %v1959_v39 = vmul.f32 %v4211_v36, %v4585_v2  ;;  %v1963_v24 = vmul.f32 %v4211_v36, %v4586_v43  ;;  %v4595_v23 = vld [vmem:[#allocation39_spill] sm:$0xff]  ;;  %v3140_v33 = vld [vmem:[#allocation7 + $0xe0] sm:$0xff]  }
 0x420   :  { %2822 = vmatpush3.bf16.msra.mxu0 %v3135_v10  ;;  %v1969_v30 = vmul.f32 %v4217_v41, %v4587_v54  ;;  %v2035_v13 = vadd.f32 %v4251_v31, %v1950_v52  ;;  %v2039_v8 = vadd.f32 %v4251_v31, %v1954_v26  ;;  %v1973_v27 = vmul.f32 %v4217_v41, %v4588_v62  ;;  %v3139_v26 = vld [vmem:[#allocation7 + $0x98] sm:$0xff]  }
 0x421   :  { %2823 = vmatprep.subr.bf16.mxu0 %v3136_v59  ;;  %v2045_v12 = vadd.f32 %v4257_v46, %v1960_v19  ;;  %v2049_v16 = vadd.f32 %v4257_v46, %v1964_v50  ;;  %v2044_v34 = vadd.f32 %v4254_v40, %v1959_v39  ;;  %v2048_v4 = vadd.f32 %v4254_v40, %v1963_v24  ;;  %v4597_v24 = vld [vmem:[#allocation28_spill] sm:$0xff] }
 0x422   :  { %v2054_v57 = vadd.f32 %v4260_v20, %v1969_v30  ;;  %v2058_v49 = vadd.f32 %v4260_v20, %v1973_v27  ;;  %v1958_v17 = vmul.f32 %v4208_v61, %v4589_v58  ;;  %v1962_v47 = vmul.f32 %v4208_v61, %v4590_v44  ;;  %v4598_v30 = vld [vmem:[#allocation32_spill] sm:$0xff] }
 0x423   :  { %2419 = vmatmul.mubr.bf16.gmra.mrb[52].mxu0 %v2087_v29  ;;  %2524 = vmatmul.mubr.bf16.gmra.mrb[68].mxu1 %v2093_v0  ;;  %v1968_v11 = vmul.f32 %v4214_v7, %v4591_v6  ;;  %v1972_v1 = vmul.f32 %v4214_v7, %v4592_v14  ;;  %v1967_v3 = vmul.f32 %v4211_v36, %v4593_v53  ;;  %v4596_v29 = vld [vmem:[#allocation43_spill] sm:$0xff] }
 0x424   :  { %2426 = vmatprep.mubr.bf16.mxu0 %v2092_v28  ;;  %2531 = vmatprep.mubr.bf16.mxu1 %v2098_v60  ;;  %v2091_v48 = vpack.c.bf16 %v2039_v8, %v2035_v13  ;;  %v1971_v56 = vmul.f32 %v4211_v36, %v4594_v37  ;;  %v1977_v10 = vmul.f32 %v4217_v41, %v4595_v23  ;;  %v3141_v8 = vld [vmem:[#allocation7 + $0xa0] sm:$0xff]   ;;  %v4603_v23 = vld [vmem:[#allocation13_spill] sm:$0xff] }
 0x425   :  { %2824 = vmatpush3.bf16.msra.mxu0 %v3137_v22  ;;  %v1981_v0 = vmul.f32 %v4217_v41, %v4596_v29  ;;  %v2097_v59 = vpack.c.bf16 %v2049_v16, %v2045_v12  ;;  %v2096_v42 = vpack.c.bf16 %v2048_v4, %v2044_v34  ;;  %v2043_v52 = vadd.f32 %v4251_v31, %v1958_v17  ;;  %v4599_v22 = vld [vmem:[#allocation37_spill] sm:$0xff]  ;;  %v4604_v29 = vld [vmem:[#allocation15_spill] sm:$0xff] }
 0x426   :  { %2825 = vmatprep.subr.bf16.mxu0 %v3138_v32  ;;  %v2047_v25 = vadd.f32 %v4251_v31, %v1962_v47  ;;  %v2102_v28 = vpack.c.bf16 %v2058_v49, %v2054_v57  ;;  %v2053_v60 = vadd.f32 %v4257_v46, %v1968_v11  ;;  %v2057_v9 = vadd.f32 %v4257_v46, %v1972_v1  ;;  %v4600_v16 = vld [vmem:[#allocation41_spill] sm:$0xff]  ;;  %v4601_v11 = vld [vmem:[#allocation38_spill] sm:$0xff] }
 0x427   :  { %v2052_v19 = vadd.f32 %v4254_v40, %v1967_v3  ;;  %v2056_v50 = vadd.f32 %v4254_v40, %v1971_v56  ;;  %v2062_v2 = vadd.f32 %v4260_v20, %v1977_v10  ;;  %v2066_v39 = vadd.f32 %v4260_v20, %v1981_v0  ;;  %v4602_v1 = vld [vmem:[#allocation42_spill] sm:$0xff]  ;;  %v3143_v3 = vld [vmem:[#allocation7 + $0xa8] sm:$0xff]  }
 0x428   :  { %v1993_v43 = vmul.f32 %v4217_v41, %v4168_v18  ;;  %v1966_v54 = vmul.f32 %v4208_v61, %v4597_v24  ;;  %v1970_v13 = vmul.f32 %v4208_v61, %v4598_v30  ;;  %v4358_v62 = vadd.f32 %v4260_v20, %v4225_v38  ;;  %v3142_v18 = vld [vmem:[#allocation7 + $0xe8] sm:$0xff]   ;;  %v3144_v56 = vld [vmem:[#allocation7 + $0xf0] sm:$0xff]  }
 0x429   :  { %2826 = vmatpush3.bf16.msra.mxu0 %v3139_v26  ;;  %v2095_v27 = vpack.c.bf16 %v2047_v25, %v2043_v52  ;;  %v1976_v12 = vmul.f32 %v4214_v7, %v4599_v22  ;;  %v1980_v34 = vmul.f32 %v4214_v7, %v4600_v16  ;;  %v2101_v57 = vpack.c.bf16 %v2057_v9, %v2053_v60  ;;  %v4606_v26 = vld [vmem:[#allocation14_spill] sm:$0xff]  ;;  %v4607_v22 = vld [vmem:[#allocation36_spill] sm:$0xff] }
 0x42a   :  { %2827 = vmatprep.subr.bf16.mxu0 %v3140_v33  ;;  %v4365_v4 = vadd.f32 %v4260_v20, %v1993_v43  ;;  %v2100_v49 = vpack.c.bf16 %v2056_v50, %v2052_v19  ;;  %v2106_v32 = vpack.c.bf16 %v2066_v39, %v2062_v2  ;;  %v2051_v58 = vadd.f32 %v4251_v31, %v1966_v54  ;;  %v3146_v2 = vld [vmem:[#allocation7 + $0xf8] sm:$0xff]  }
 0x42b   :  { %2427 = vmatmul.mubr.bf16.gmra.mrb[56].mxu0 %v2091_v48  ;;  %2532 = vmatmul.mubr.bf16.gmra.mrb[72].mxu1 %v2097_v59  ;;  %v2055_v38 = vadd.f32 %v4251_v31, %v1970_v13  ;;  %v2061_v17 = vadd.f32 %v4257_v46, %v1976_v12  ;;  %v1990_v47 = vmul.f32 %v4208_v61, %v4160_v21  ;;  %v3147_v13 = vld [vmem:[#allocation7 + $0xb8] sm:$0xff]  }
 0x42c   :  { %2434 = vmatprep.mubr.bf16.mxu0 %v2096_v42  ;;  %2539 = vmatprep.mubr.bf16.mxu1 %v2102_v28  ;;  %v2114_v44 = vpack.c.bf16 %v4358_v62, %v4365_v4  ;;  %v2065_v6 = vadd.f32 %v4257_v46, %v1980_v34  ;;  %v1975_v14 = vmul.f32 %v4211_v36, %v4601_v11 }
 0x42d   :  { %2828 = vmatpush3.bf16.msra.mxu0 %v3141_v8  ;;  %v1979_v53 = vmul.f32 %v4211_v36, %v4602_v1  ;;  %v1994_v48 = vmul.f32 %v4208_v61, %v4184_v35  ;;  %v1985_v37 = vmul.f32 %v4217_v41, %v4120_v55  ;;  %v4384_v21 = vadd.f32 %v4251_v31, %v1990_v47  ;;  %v4605_v55 = vld [vmem:[#allocation12_spill] sm:$0xff] }
 0x42e   :  { %2829 = vmatprep.subr.bf16.mxu0 %v3142_v18  ;;  %v1937_v10 = vmul.f32 %v4217_v41, %v4603_v23  ;;  %v1941_v0 = vmul.f32 %v4217_v41, %v4604_v29  ;;  %v1989_v59 = vmul.f32 %v4217_v41, %v4142_v15  ;;  %v1936_v42 = vmul.f32 %v4214_v7, %v4605_v55  ;;  %v3145_v41 = vld [vmem:[#allocation7 + $0xb0] sm:$0xff]   ;;  %v4614_v23 = vld [vmem:[#allocation49_spill] sm:$0xff] }
 0x42f   :  { %v4393_v35 = vadd.f32 %v4251_v31, %v1994_v48  ;;  %v1940_v28 = vmul.f32 %v4214_v7, %v4606_v26  ;;  %v2060_v60 = vadd.f32 %v4254_v40, %v1975_v14  ;;  %v2064_v15 = vadd.f32 %v4254_v40, %v1979_v53  ;;  %v4609_v14 = vld [vmem:[#allocation44_spill] sm:$0xff]  ;;  %v4611_v53 = vld [vmem:[#allocation46_spill] sm:$0xff] }
 0x430   :  { %v4398_v52 = vadd.f32 %v4260_v20, %v1937_v10  ;;  %v4401_v25 = vadd.f32 %v4260_v20, %v1941_v0  ;;  %v2021_v19 = vadd.f32 %v4257_v46, %v1936_v42  ;;  %v2070_v33 = vadd.f32 %v4260_v20, %v1985_v37  ;;  %v4612_v48 = vld [vmem:[#allocation48_spill] sm:$0xff] }
 0x431   :  { %2830 = vmatpush3.bf16.msra.mxu0 %v3143_v3  ;;  %v2111_v9 = vpack.c.bf16 %v4393_v35, %v4384_v21  ;;  %v2074_v50 = vadd.f32 %v4260_v20, %v1989_v59  ;;  %v2025_v43 = vadd.f32 %v4257_v46, %v1940_v28  ;;  %v2099_v54 = vpack.c.bf16 %v2055_v38, %v2051_v58  ;;  %v4608_v20 = vld [vmem:[#allocation40_spill] sm:$0xff] }
 0x432   :  { %2831 = vmatprep.subr.bf16.mxu0 %v3144_v56  ;;  %v2086_v39 = vpack.c.bf16 %v4401_v25, %v4398_v52  ;;  %v2105_v30 = vpack.c.bf16 %v2065_v6, %v2061_v17  ;;  %v2104_v8 = vpack.c.bf16 %v2064_v15, %v2060_v60  ;;  %v1974_v12 = vmul.f32 %v4208_v61, %v4607_v22  ;;  %v4613_v56 = vld [vmem:[#allocation47_spill] sm:$0xff] }
 0x433   :  { %2435 = vmatmul.mubr.bf16.gmra.mrb[60].mxu0 %v2095_v27  ;;  %2540 = vmatmul.mubr.bf16.gmra.mrb[76].mxu1 %v2101_v57  ;;  %v2085_v24 = vpack.c.bf16 %v2025_v43, %v2021_v19  ;;  %v2110_v27 = vpack.c.bf16 %v2074_v50, %v2070_v33  ;;  %v1978_v16 = vmul.f32 %v4208_v61, %v4608_v20 }
 0x434   :  { %2442 = vmatprep.mubr.bf16.mxu0 %v2100_v49  ;;  %2547 = vmatprep.mubr.bf16.mxu1 %v2106_v32  ;;  %v1984_v34 = vmul.f32 %v4214_v7, %v4114_v5  ;;  %v1988_v18 = vmul.f32 %v4214_v7, %v4138_v51  ;;  %v1983_v57 = vmul.f32 %v4211_v36, %v4118_v63 }
 0x435   :  { %2832 = vmatpush3.bf16.msra.mxu0 %v3145_v41  ;;  %v1987_v49 = vmul.f32 %v4211_v36, %v4140_v45  ;;  %v2059_v32 = vadd.f32 %v4251_v31, %v1974_v12  ;;  %v2063_v58 = vadd.f32 %v4251_v31, %v1978_v16  ;;  %v1982_v63 = vmul.f32 %v4208_v61, %v4609_v14  ;;  %v4610_v45 = vld [vmem:[#allocation45_spill] sm:$0xff] }
 0x436   :  { %2833 = vmatprep.subr.bf16.mxu0 %v3146_v2  ;;  %v2069_v38 = vadd.f32 %v4257_v46, %v1984_v34  ;;  %v2073_v17 = vadd.f32 %v4257_v46, %v1988_v18  ;;  %v2068_v5 = vadd.f32 %v4254_v40, %v1983_v57  ;;  %v1986_v1 = vmul.f32 %v4208_v61, %v4610_v45 }
 0x437   :  { %v2072_v51 = vadd.f32 %v4254_v40, %v1987_v49  ;;  %v2103_v47 = vpack.c.bf16 %v2063_v58, %v2059_v32  ;;  %v1992_v3 = vmul.f32 %v4214_v7, %v4611_v53  ;;  %v1996_v37 = vmul.f32 %v4214_v7, %v4612_v48 }
 0x438   :  { %v2109_v6 = vpack.c.bf16 %v2073_v17, %v2069_v38  ;;  %v1991_v21 = vmul.f32 %v4211_v36, %v4613_v56  ;;  %v1995_v10 = vmul.f32 %v4211_v36, %v4614_v23  ;;  %v2067_v29 = vadd.f32 %v4251_v31, %v1982_v63 }
 0x439   :  { %2834 = vmatpush3.bf16.msra.mxu0 %v3147_v13  ;;  %v2108_v11 = vpack.c.bf16 %v2072_v51, %v2068_v5  ;;  %v2071_v61 = vadd.f32 %v4251_v31, %v1986_v1  ;;  %v2077_v0 = vadd.f32 %v4257_v46, %v1992_v3  ;;  %v2081_v59 = vadd.f32 %v4257_v46, %v1996_v37 }
 0x43a   :  { %v2076_v7 = vadd.f32 %v4254_v40, %v1991_v21  ;;  %v2080_v35 = vadd.f32 %v4254_v40, %v1995_v10 }
 0x43b   :  { %2443 = vmatmul.mubr.bf16.gmra.mrb[64].mxu0 %v2099_v54  ;;  %2548 = vmatmul.mubr.bf16.gmra.mrb[80].mxu1 %v2105_v30  ;;  %v2107_v62 = vpack.c.bf16 %v2071_v61, %v2067_v29  ;;  %v2113_v4 = vpack.c.bf16 %v2081_v59, %v2077_v0 }
 0x43c   :  { %2450 = vmatprep.mubr.bf16.mxu0 %v2104_v8  ;;  %2555 = vmatprep.mubr.bf16.mxu1 %v2110_v27 }
 0x443   :  { %2451 = vmatmul.mubr.bf16.gmra.mrb[68].mxu0 %v2103_v47  ;;  %2556 = vmatmul.mubr.bf16.gmra.mrb[84].mxu1 %v2109_v6 }
 0x444   :  { %2458 = vmatprep.mubr.bf16.mxu0 %v2108_v11  ;;  %2563 = vmatprep.mubr.bf16.mxu1 %v2114_v44  ;;  %v2112_v44 = vpack.c.bf16 %v2080_v35, %v2076_v7 }
 0x44b   :  { %2459 = vmatmul.mubr.bf16.gmra.mrb[72].mxu0 %v2107_v62  ;;  %2564 = vmatmul.mubr.bf16.gmra.mrb[88].mxu1 %v2113_v4 }
 0x44c   :  { %2466 = vmatprep.mubr.bf16.mxu0 %v2112_v44 }
 0x453   :  { %2467 = vmatmul.mubr.bf16.gmra.mrb[76].mxu0 %v2111_v9 }
 0x454   :  { %2507 = vmatprep.mubr.bf16.mxu0 %v2086_v39 }
 0x45b   :  { %2508 = vmatmul.mubr.bf16.vlgmr.msra.gmra.mrb[80].mxu0 %v2085_v24  ;;  %v4461_v24 = vld [vmem:[%s4499_s6] ss:$0 sm:$0xff]  ;;  %s3253_s6 = smov [#allocation8]  }
 0x45c   :  { %s2609_s29 = sshll.u32 %s3253_s6, 4  ;;  %s2610_s29 = int_to_ptr.vmem [resolvable:$true] %s2609_s29 }
 0x45d   :  { %s3214_s0 = scalar_lea.vmem %s2610_s29, 2048  ;;  %p3219_p11 = scmp.lt.s32.totalorder %s2610_s29, %s2610_s29 }
 0x45e   :  { %p3215_p10 = scmp.ne.s32.totalorder %s2610_s29, %s3214_s0  ;;  %p3220_p12 = scmp.lt.s32.totalorder %s3214_s0, %s3214_s0 }
 0x460   :  { %p3221_p13 = por %p3220_p12, %p3219_p11 }
 0x462   :  { %p3222_p0 = pnand %p3221_p13, %p3215_p10 }
 0x4ee   :  { %v2771_v36 = vpop.f32.mrb[48].mxu0  ;;  %v2841_v55 = vpop.f32.mrb[64].mxu1 }
 0x4ef   :  { %v2772_v31 = vpop.f32.mrb[49].mxu0  ;;  %v2842_v42 = vpop.f32.mrb[65].mxu1 }
 0x4f0   :  { %v4454_v52 = vadd.f32 %v2772_v31, %v2771_v36  ;;  %v2843_v46 = vadd.f32 %v2842_v42, %v2841_v55  ;;  %v2774_v25 = vpop.f32.mrb[50].mxu0  ;;  %v2844_v26 = vpop.f32.mrb[66].mxu1 }
 0x4f1   :  { %v2775_v28 = vpop.f32.mrb[51].mxu0  ;;  %v2845_v40 = vpop.f32.mrb[67].mxu1 }
 0x4f2   :  { %v4456_v60 = vadd.f32 %v2775_v28, %v2774_v25  ;;  %v2846_v15 = vadd.f32 %v2845_v40, %v2844_v26 }
 0x4f6   :  { %v2777_v41 = vpop.f32.mrb[52].mxu0  ;;  %v2847_v19 = vpop.f32.mrb[68].mxu1 }
 0x4f7   :  { %v2778_v33 = vpop.f32.mrb[53].mxu0  ;;  %v2848_v9 = vpop.f32.mrb[69].mxu1 }
 0x4f8   :  { %v2779_v50 = vadd.f32 %v2778_v33, %v2777_v41  ;;  %v2849_v2 = vadd.f32 %v2848_v9, %v2847_v19  ;;  %v2780_v39 = vpop.f32.mrb[54].mxu0  ;;  %v2850_v43 = vpop.f32.mrb[70].mxu1 }
 0x4f9   :  { %v2781_v54 = vpop.f32.mrb[55].mxu0  ;;  %v2851_v30 = vpop.f32.mrb[71].mxu1 }
 0x4fa   :  { %v2421_v13 = vadd.f32 %v2779_v50, %v4461_v24  ;;  %v2782_v8 = vadd.f32 %v2781_v54, %v2780_v39  ;;  %v2852_v27 = vadd.f32 %v2851_v30, %v2850_v43 }
 0x4fc   :  { %v2518_v22 = vadd.f32 %v2843_v46, %v2421_v13  ;;  %v2424_v12 = vadd.f32 %v2782_v8, %v4461_v24 }
 0x4fe   :  { %3101 = vtanh.f32 %v2518_v22  ;;  %v2521_v20 = vadd.f32 %v2846_v15, %v2424_v12  ;;  %v2783_v16 = vpop.f32.mrb[56].mxu0  ;;  %v2853_v34 = vpop.f32.mrb[72].mxu1 }
 0x4ff   :  { %v2784_v18 = vpop.f32.mrb[57].mxu0  ;;  %v2854_v57 = vpop.f32.mrb[73].mxu1 }
 0x500   :  { %3103 = vtanh.f32 %v2521_v20  ;;  %v2785_v49 = vadd.f32 %v2784_v18, %v2783_v16  ;;  %v2855_v32 = vadd.f32 %v2854_v57, %v2853_v34  ;;  %v2786_v58 = vpop.f32.mrb[58].mxu0  ;;  %v2856_v38 = vpop.f32.mrb[74].mxu1 }
 0x501   :  { %v2787_v17 = vpop.f32.mrb[59].mxu0  ;;  %v2857_v5 = vpop.f32.mrb[75].mxu1 }
 0x502   :  { %v2429_v51 = vadd.f32 %v2785_v49, %v4461_v24  ;;  %v2788_v47 = vadd.f32 %v2787_v17, %v2786_v58  ;;  %v2858_v6 = vadd.f32 %v2857_v5, %v2856_v38 }
 0x504   :  { %v2526_v11 = vadd.f32 %v2849_v2, %v2429_v51  ;;  %v2432_v14 = vadd.f32 %v2788_v47, %v4461_v24 }
 0x506   :  { %3105 = vtanh.f32 %v2526_v11  ;;  %v2529_v63 = vadd.f32 %v2852_v27, %v2432_v14  ;;  %v2789_v45 = vpop.f32.mrb[60].mxu0  ;;  %v2859_v1 = vpop.f32.mrb[76].mxu1 }
 0x507   :  { %v2790_v53 = vpop.f32.mrb[61].mxu0  ;;  %v2860_v3 = vpop.f32.mrb[77].mxu1 }
 0x508   :  { %v3102_v48 = vpop.eup %3101  ;;  %3107 = vtanh.f32 %v2529_v63  ;;  %v2791_v37 = vadd.f32 %v2790_v53, %v2789_v45  ;;  %v2861_v56 = vadd.f32 %v2860_v3, %v2859_v1  ;;  %v2792_v21 = vpop.f32.mrb[62].mxu0 }
 0x509   :  { %v2862_v23 = vpop.f32.mrb[78].mxu1  ;;  %2590 = vst [vmem:[#allocation8 + $0x10] sm:$0xff] %v3102_v48  ;;  %v2793_v10 = vpop.f32.mrb[63].mxu0 }
 0x50a   :  { %v2863_v29 = vpop.f32.mrb[79].mxu1  ;;  %v3104_v61 = vpop.eup %3103  ;;  %v2437_v0 = vadd.f32 %v2791_v37, %v4461_v24  ;;  %v2794_v59 = vadd.f32 %v2793_v10, %v2792_v21 }
 0x50b   :  { %v2864_v7 = vadd.f32 %v2863_v29, %v2862_v23  ;;  %2591 = vst [vmem:[#allocation8 + $0x18] sm:$0xff] %v3104_v61 }
 0x50c   :  { %v2534_v35 = vadd.f32 %v2855_v32, %v2437_v0  ;;  %v2440_v62 = vadd.f32 %v2794_v59, %v4461_v24 }
 0x50e   :  { %3109 = vtanh.f32 %v2534_v35  ;;  %v2537_v4 = vadd.f32 %v2858_v6, %v2440_v62  ;;  %v2795_v44 = vpop.f32.mrb[64].mxu0  ;;  %v2865_v36 = vpop.f32.mrb[80].mxu1 }
 0x50f   :  { %v2796_v55 = vpop.f32.mrb[65].mxu0  ;;  %v2866_v31 = vpop.f32.mrb[81].mxu1 }
 0x510   :  { %v3106_v42 = vpop.eup %3105  ;;  %3111 = vtanh.f32 %v2537_v4  ;;  %v2797_v46 = vadd.f32 %v2796_v55, %v2795_v44  ;;  %v2867_v25 = vadd.f32 %v2866_v31, %v2865_v36  ;;  %v2798_v26 = vpop.f32.mrb[66].mxu0 }
 0x511   :  { %v2868_v28 = vpop.f32.mrb[82].mxu1  ;;  %2592 = vst [vmem:[#allocation8 + $0x20] sm:$0xff] %v3106_v42  ;;  %v2799_v40 = vpop.f32.mrb[67].mxu0 }
 0x512   :  { %v2869_v15 = vpop.f32.mrb[83].mxu1  ;;  %v3108_v41 = vpop.eup %3107  ;;  %v2445_v19 = vadd.f32 %v2797_v46, %v4461_v24  ;;  %v2800_v33 = vadd.f32 %v2799_v40, %v2798_v26 }
 0x513   :  { %v2870_v9 = vadd.f32 %v2869_v15, %v2868_v28  ;;  %2593 = vst [vmem:[#allocation8 + $0x28] sm:$0xff] %v3108_v41  ;;  %v2413_v28 = vadd.f32 %v4454_v52, %v4461_v24 }
 0x514   :  { %v2542_v50 = vadd.f32 %v2861_v56, %v2445_v19  ;;  %v2448_v2 = vadd.f32 %v2800_v33, %v4461_v24  ;;  %v2416_v33 = vadd.f32 %v4456_v60, %v4461_v24 }
 0x516   :  { %3113 = vtanh.f32 %v2542_v50  ;;  %v2545_v39 = vadd.f32 %v2864_v7, %v2448_v2  ;;  %v2801_v43 = vpop.f32.mrb[68].mxu0  ;;  %v2871_v54 = vpop.f32.mrb[84].mxu1 }
 0x517   :  { %v2802_v30 = vpop.f32.mrb[69].mxu0  ;;  %v2872_v13 = vpop.f32.mrb[85].mxu1 }
 0x518   :  { %v3110_v8 = vpop.eup %3109  ;;  %3115 = vtanh.f32 %v2545_v39  ;;  %v2803_v27 = vadd.f32 %v2802_v30, %v2801_v43  ;;  %v2873_v22 = vadd.f32 %v2872_v13, %v2871_v54  ;;  %v2804_v12 = vpop.f32.mrb[70].mxu0 }
 0x519   :  { %v2874_v20 = vpop.f32.mrb[86].mxu1  ;;  %2594 = vst [vmem:[#allocation8 + $0x30] sm:$0xff] %v3110_v8  ;;  %v2805_v16 = vpop.f32.mrb[71].mxu0 }
 0x51a   :  { %v2875_v34 = vpop.f32.mrb[87].mxu1  ;;  %v3112_v18 = vpop.eup %3111  ;;  %v2453_v57 = vadd.f32 %v2803_v27, %v4461_v24  ;;  %v2806_v49 = vadd.f32 %v2805_v16, %v2804_v12 }
 0x51b   :  { %v2876_v32 = vadd.f32 %v2875_v34, %v2874_v20  ;;  %2595 = vst [vmem:[#allocation8 + $0x38] sm:$0xff] %v3112_v18 }
 0x51c   :  { %v2550_v58 = vadd.f32 %v2867_v25, %v2453_v57  ;;  %v2456_v38 = vadd.f32 %v2806_v49, %v4461_v24 }
 0x51e   :  { %3117 = vtanh.f32 %v2550_v58  ;;  %v2553_v17 = vadd.f32 %v2870_v9, %v2456_v38  ;;  %v2807_v5 = vpop.f32.mrb[72].mxu0  ;;  %v2877_v51 = vpop.f32.mrb[88].mxu1 }
 0x51f   :  { %v2808_v47 = vpop.f32.mrb[73].mxu0  ;;  %v2878_v6 = vpop.f32.mrb[89].mxu1 }
 0x520   :  { %v3114_v11 = vpop.eup %3113  ;;  %3119 = vtanh.f32 %v2553_v17  ;;  %v2809_v14 = vadd.f32 %v2808_v47, %v2807_v5  ;;  %v2879_v63 = vadd.f32 %v2878_v6, %v2877_v51  ;;  %v2810_v45 = vpop.f32.mrb[74].mxu0 }
 0x521   :  { %v2880_v1 = vpop.f32.mrb[90].mxu1  ;;  %2596 = vst [vmem:[#allocation8 + $0x40] sm:$0xff] %v3114_v11  ;;  %v2811_v53 = vpop.f32.mrb[75].mxu0 }
 0x522   :  { %v2881_v3 = vpop.f32.mrb[91].mxu1  ;;  %v3116_v48 = vpop.eup %3115  ;;  %v2461_v37 = vadd.f32 %v2809_v14, %v4461_v24  ;;  %v2812_v56 = vadd.f32 %v2811_v53, %v2810_v45 }
 0x523   :  { %v2882_v21 = vadd.f32 %v2881_v3, %v2880_v1  ;;  %2597 = vst [vmem:[#allocation8 + $0x48] sm:$0xff] %v3116_v48 }
 0x524   :  { %v2558_v23 = vadd.f32 %v2873_v22, %v2461_v37  ;;  %v2464_v10 = vadd.f32 %v2812_v56, %v4461_v24 }
 0x526   :  { %3121 = vtanh.f32 %v2558_v23  ;;  %v2561_v29 = vadd.f32 %v2876_v32, %v2464_v10  ;;  %v2813_v61 = vpop.f32.mrb[76].mxu0 }
 0x527   :  { %v2814_v0 = vpop.f32.mrb[77].mxu0 }
 0x528   :  { %v3118_v59 = vpop.eup %3117  ;;  %3123 = vtanh.f32 %v2561_v29  ;;  %v2815_v7 = vadd.f32 %v2814_v0, %v2813_v61  ;;  %v2816_v35 = vpop.f32.mrb[78].mxu0 }
 0x529   :  { %2598 = vst [vmem:[#allocation8 + $0x50] sm:$0xff] %v3118_v59  ;;  %v2817_v62 = vpop.f32.mrb[79].mxu0 }
 0x52a   :  { %v3120_v4 = vpop.eup %3119  ;;  %v2469_v44 = vadd.f32 %v2815_v7, %v4461_v24  ;;  %v2818_v36 = vadd.f32 %v2817_v62, %v2816_v35 }
 0x52b   :  { %2599 = vst [vmem:[#allocation8 + $0x58] sm:$0xff] %v3120_v4 }
 0x52c   :  { %v2566_v55 = vadd.f32 %v2879_v63, %v2469_v44  ;;  %v2472_v31 = vadd.f32 %v2818_v36, %v4461_v24 }
 0x52e   :  { %3125 = vtanh.f32 %v2566_v55  ;;  %v2569_v42 = vadd.f32 %v2882_v21, %v2472_v31  ;;  %v2835_v46 = vpop.f32.mrb[80].mxu0 }
 0x52f   :  { %v2836_v25 = vpop.f32.mrb[81].mxu0 }
 0x530   :  { %v3122_v26 = vpop.eup %3121  ;;  %3127 = vtanh.f32 %v2569_v42  ;;  %v2837_v40 = vadd.f32 %v2836_v25, %v2835_v46  ;;  %v2838_v15 = vpop.f32.mrb[82].mxu0 }
 0x531   :  { %2600 = vst [vmem:[#allocation8 + $0x60] sm:$0xff] %v3122_v26  ;;  %v2839_v41 = vpop.f32.mrb[83].mxu0 }
 0x532   :  { %v3124_v19 = vpop.eup %3123  ;;  %v2510_v9 = vadd.f32 %v2837_v40, %v2413_v28  ;;  %v2840_v50 = vadd.f32 %v2839_v41, %v2838_v15 }
 0x533   :  { %2601 = vst [vmem:[#allocation8 + $0x68] sm:$0xff] %v3124_v19 }
 0x534   :  { %3129 = vtanh.f32 %v2510_v9  ;;  %v2513_v2 = vadd.f32 %v2840_v50, %v2416_v33 }
 0x536   :  { %3131 = vtanh.f32 %v2513_v2 }
 0x538   :  { %v3126_v39 = vpop.eup %3125 }
 0x539   :  { %2602 = vst [vmem:[#allocation8 + $0x70] sm:$0xff] %v3126_v39 }
 0x53a   :  { %v3128_v43 = vpop.eup %3127 }
 0x53b   :  { %2603 = vst [vmem:[#allocation8 + $0x78] sm:$0xff] %v3128_v43 }
 0x53e   :  { %v3130_v52 = vpop.eup %3129 }
 0x53f   :  { %2588 = vst [vmem:[#allocation8] sm:$0xff] %v3130_v52 }
 0x540   :  { %v3132_v54 = vpop.eup %3131 }
 0x541   :  { %2589 = vst [vmem:[#allocation8 + $0x8] sm:$0xff] %v3132_v54 }
 0x542   :  { %3225 = shalt.err (!%p3222_p0)
}
 0x543   :  { %s3226_s9 = scalar_lea.hbm %s4500_s7, 2048 }
 0x544   :  { %p3227_p1 = scmp.ne.s32.totalorder %s4500_s7, %s3226_s9  ;;  %p3230_p2 = scmp.lt.u32.totalorder %s3226_s9, %s4500_s7 }
 0x546   :  { %p3232_p3 = pnand %p3230_p2, %p3227_p1 }
 0x548   :  { %3235 = shalt.err (!%p3232_p3)
}
 0x549   :  { %s3254_s14 = smov 128   ;;  %s3255_s1 = smov 8  }
 0x54a   :  { %2615 = dma.vmem_to_hbm [thread:$0]  %s2610_s29, 2048, %s4500_s7, [#allocation4], %s3254_s14, %s3254_s14, %s3255_s1  }
 0x54b   :  { %3240 = dma.done.wait [#allocation4], 2048  }
 0x54c   :  { %3241 = vsyncadd [#allocation4], 4294965248 }
 0x54d   :  { %2619 = vsyncpa [#allocation3], 1 }
 0x54e   :  { %2620 = vsyncpa [#allocation6], 1 }
 0x54f   :  { %2621 = vsyncpa [#allocation4], 1 }

</bundles_post_ra>
